<compile_context>
chip_gen: v7x
topology: tpu7x:2x2x1
jax: 0.10.0
libtpu: 0.0.40
codegen_flags: <defaults>
</compile_context>

<pallas_src>
import jax
import jax.numpy as jnp
import numpy as np
from jax import lax
from jax.experimental import pallas as pl
from jax.experimental.pallas import tpu as pltpu

MATMUL_DTYPE = jnp.bfloat16   # MXU operand dtype; accumulation stays f32.


# ----------------------------------------------------------------------------
# Pallas kernels
# ----------------------------------------------------------------------------
def linear_kernel(x_ref, w_ref, b_ref, o_ref):
    x = x_ref[...].astype(w_ref.dtype)
    o_ref[...] = (jnp.dot(x, w_ref[...], preferred_element_type=jnp.float32)
                  + b_ref[...])


def pallas_linear(x2d, w_t, b_row):
    """x2d: (N, Din) f32;  w_t: (Din, Dout) matmul dtype;  b_row: (1, Dout) f32."""
    N = x2d.shape[0]
    Dout = w_t.shape[1]
    # Shapes here are tiny (single full-array block).
    # TODO(synk): add a row/col-tiled grid for production-sized N / Dout.
    return pl.pallas_call(
        linear_kernel,
        out_shape=jax.ShapeDtypeStruct((N, Dout), jnp.float32),
    )(jnp.asarray(x2d, jnp.float32), w_t, jnp.asarray(b_row, jnp.float32))


def bilstm_chunk_kernel(gxf_ref, gxb_ref, whh_ref,
                        outf_ref, outb_ref, h_ref, c_ref):
    """Fused fwd+bwd LSTM recurrence over a chunk of T timesteps.

    gxf_ref : (T, B, 4H)  precomputed x@W_ih + (b_ih+b_hh), forward, time block i
    gxb_ref : (T, B, 4H)  same for backward direction, time block (nc-1-i)
    whh_ref : (2, H, 4H)  recurrent weights (transposed), [fwd, bwd], bf16
    outf_ref: (T, B, H)   forward hidden outputs, time block i
    outb_ref: (T, B, H)   backward hidden outputs, time block (nc-1-i)
    h_ref   : (2, B, H)   resident carry / final hidden state [fwd, bwd]
    c_ref   : (2, B, H)   resident carry / final cell state   [fwd, bwd]
    """
    chunk = pl.program_id(0)
    T = gxf_ref.shape[0]
    H = h_ref.shape[-1]
    mm_dtype = whh_ref.dtype

    @pl.when(chunk == 0)
    def _():
        h_ref[...] = jnp.zeros_like(h_ref)
        c_ref[...] = jnp.zeros_like(c_ref)

    w_f = whh_ref[0]          # (H, 4H)
    w_b = whh_ref[1]

    def cell(gates, c_prev):
        # PyTorch gate order: i, f, g, o.  All element-wise math in f32.
        i_g = jax.nn.sigmoid(gates[:, 0 * H:1 * H])
        f_g = jax.nn.sigmoid(gates[:, 1 * H:2 * H])
        g_g = jnp.tanh(gates[:, 2 * H:3 * H])
        o_g = jax.nn.sigmoid(gates[:, 3 * H:4 * H])
        c_new = f_g * c_prev + i_g * g_g
        h_new = o_g * jnp.tanh(c_new)
        return h_new, c_new

    def step(tt, carry):
        h_f, c_f, h_b, c_b = carry
        rec_f = jnp.dot(h_f.astype(mm_dtype), w_f,
                        preferred_element_type=jnp.float32)
        rec_b = jnp.dot(h_b.astype(mm_dtype), w_b,
                        preferred_element_type=jnp.float32)
        h_f, c_f = cell(rec_f + gxf_ref[tt], c_f)
        h_b, c_b = cell(rec_b + gxb_ref[T - 1 - tt], c_b)
        outf_ref[tt] = h_f
        outb_ref[T - 1 - tt] = h_b
        return (h_f, c_f, h_b, c_b)

    h_f, c_f, h_b, c_b = lax.fori_loop(
        0, T, step, (h_ref[0], c_ref[0], h_ref[1], c_ref[1]), unroll=True)

    # Write the carries back every grid step (robust; also the final states).
    h_ref[0] = h_f
    h_ref[1] = h_b
    c_ref[0] = c_f
    c_ref[1] = c_b


def run_bilstm_layer(x, p_fwd, p_bwd, chunk, matmul_dtype=MATMUL_DTYPE):
    """x: (S, B, D) f32 -> (out (S,B,2H), h_last (2,B,H), c_last (2,B,H))."""
    S, B, D = x.shape
    H = p_fwd["w_hh"].shape[1]
    T = chunk
    assert S % T == 0
    nc = S // T

    # ---- Hoisted input projection: one big MXU matmul for both directions ----
    wih = jnp.concatenate([p_fwd["w_ih"].T, p_bwd["w_ih"].T],
                          axis=1).astype(matmul_dtype)                   # (D, 8H)
    bias = jnp.concatenate([p_fwd["b_ih"] + p_fwd["b_hh"],
                            p_bwd["b_ih"] + p_bwd["b_hh"]])[None, :]     # (1, 8H)
    gx = pallas_linear(x.reshape(S * B, D), wih, bias).reshape(S, B, 8 * H)
    gx_f = gx[..., :4 * H]                                               # (S, B, 4H)
    gx_b = gx[..., 4 * H:]

    whh = jnp.stack([p_fwd["w_hh"].T, p_bwd["w_hh"].T],
                    axis=0).astype(matmul_dtype)                         # (2, H, 4H)

    # TODO(synk): on v7x the two directions could additionally be split across
    # the two TensorCores via pl.core_map; kept single-core-fused here.
    out_f, out_b, h_last, c_last = pl.pallas_call(
        bilstm_chunk_kernel,
        grid=(nc,),
        in_specs=[
            pl.BlockSpec((T, B, 4 * H), lambda i: (i, 0, 0)),
            pl.BlockSpec((T, B, 4 * H), lambda i: (nc - 1 - i, 0, 0)),
            pl.BlockSpec((2, H, 4 * H), lambda i: (0, 0, 0)),
        ],
        out_specs=[
            pl.BlockSpec((T, B, H), lambda i: (i, 0, 0)),
            pl.BlockSpec((T, B, H), lambda i: (nc - 1 - i, 0, 0)),
            pl.BlockSpec((2, B, H), lambda i: (0, 0, 0)),
            pl.BlockSpec((2, B, H), lambda i: (0, 0, 0)),
        ],
        out_shape=[
            jax.ShapeDtypeStruct((S, B, H), jnp.float32),
            jax.ShapeDtypeStruct((S, B, H), jnp.float32),
            jax.ShapeDtypeStruct((2, B, H), jnp.float32),
            jax.ShapeDtypeStruct((2, B, H), jnp.float32),
        ],
        compiler_params=pltpu.CompilerParams(
            dimension_semantics=("arbitrary",)),
    )(gx_f, gx_b, whh)

    out = jnp.concatenate([out_f, out_b], axis=-1)   # (S, B, 2H), fwd || bwd
    return out, h_last, c_last


# ----------------------------------------------------------------------------
# Encoder (parameters + forward)
# ----------------------------------------------------------------------------
def init_params(key, vocab_size, emb_dim, hid_dim, n_layers=2):
    keys = iter(jax.random.split(key, 64))
    scale = 0.1
    params = {
        "emb": scale * jax.random.normal(next(keys), (vocab_size, emb_dim), jnp.float32),
        "lstm": [],
        "fc_w": scale * jax.random.normal(next(keys), (hid_dim, 2 * hid_dim), jnp.float32),
        "fc_b": scale * jax.random.normal(next(keys), (hid_dim,), jnp.float32),
    }
    for layer in range(n_layers):
        in_dim = emb_dim if layer == 0 else 2 * hid_dim
        layer_p = {}
        for d in ("fwd", "bwd"):
            layer_p[d] = {
                "w_ih": scale * jax.random.normal(next(keys), (4 * hid_dim, in_dim), jnp.float32),
                "w_hh": scale * jax.random.normal(next(keys), (4 * hid_dim, hid_dim), jnp.float32),
                "b_ih": scale * jax.random.normal(next(keys), (4 * hid_dim,), jnp.float32),
                "b_hh": scale * jax.random.normal(next(keys), (4 * hid_dim,), jnp.float32),
            }
        params["lstm"].append(layer_p)
    return params


def _pick_chunk(S, target=4):
    """Largest divisor of S that is <= target (amortizes per-grid-step cost)."""
    T = min(S, target)
    while S % T:
        T -= 1
    return max(T, 1)


def encoder_forward(params, tokens, chunk_target=4):
    """tokens: (S, B) int32 -> (outputs, (hidden, cell)), like the torch module."""
    # TODO(synk): embedding gather stays in plain JAX/XLA (no tiled hot path).
    embedded = jnp.take(params["emb"], tokens, axis=0)            # (S, B, E)
    S, B, _ = embedded.shape
    H = params["fc_w"].shape[0]
    n_layers = len(params["lstm"])
    T = _pick_chunk(S, chunk_target)

    layer_in = embedded
    h_list, c_list = [], []
    for layer_p in params["lstm"]:
        layer_in, h_last, c_last = run_bilstm_layer(
            layer_in, layer_p["fwd"], layer_p["bwd"], T)
        h_list.append(h_last)          # (2, B, H) in [fwd, bwd] order
        c_list.append(c_last)

    outputs = layer_in                                            # (S, B, 2H)
    hidden = jnp.concatenate(h_list, axis=0)   # (2L, B, H): l0f, l0b, l1f, l1b
    cell = jnp.concatenate(c_list, axis=0)

    hid_cat = jnp.concatenate([hidden[0::2], hidden[1::2]], axis=2)   # (L, B, 2H)
    cel_cat = jnp.concatenate([cell[0::2], cell[1::2]], axis=2)

    # One fused fc projection for both hidden and cell (single Pallas call).
    both = jnp.concatenate([hid_cat.reshape(n_layers * B, 2 * H),
                            cel_cat.reshape(n_layers * B, 2 * H)], axis=0)
    fc_out = pallas_linear(both,
                           params["fc_w"].T.astype(MATMUL_DTYPE),
                           params["fc_b"][None, :])
    hidden_out = fc_out[:n_layers * B].reshape(n_layers, B, H)
    cell_out = fc_out[n_layers * B:].reshape(n_layers, B, H)
    return outputs, (hidden_out, cell_out)


# ----------------------------------------------------------------------------
# Pure-JAX reference (for correctness check)
# ----------------------------------------------------------------------------
def _lstm_cell_ref(x, h, c, p):
    hp = jax.lax.Precision.HIGHEST
    gates = (jnp.dot(x, p["w_ih"].T, precision=hp)
             + jnp.dot(h, p["w_hh"].T, precision=hp)
             + p["b_ih"] + p["b_hh"])
    H = h.shape[-1]
    i = jax.nn.sigmoid(gates[:, :H])
    f = jax.nn.sigmoid(gates[:, H:2 * H])
    g = jnp.tanh(gates[:, 2 * H:3 * H])
    o = jax.nn.sigmoid(gates[:, 3 * H:])
    c = f * c + i * g
    h = o * jnp.tanh(c)
    return h, c


def encoder_ref(params, tokens):
    embedded = jnp.take(params["emb"], tokens, axis=0)
    S, B, _ = embedded.shape
    H = params["fc_w"].shape[0]
    layer_in = embedded
    h_list, c_list = [], []
    for layer_p in params["lstm"]:
        dir_out = {}
        for d, order in (("fwd", range(S)), ("bwd", range(S - 1, -1, -1))):
            p = layer_p[d]
            h = jnp.zeros((B, H), jnp.float32)
            c = jnp.zeros((B, H), jnp.float32)
            seq = [None] * S
            for t in order:
                h, c = _lstm_cell_ref(layer_in[t], h, c, p)
                seq[t] = h
            dir_out[d] = jnp.stack(seq, axis=0)
            h_list.append(h)
            c_list.append(c)
        layer_in = jnp.concatenate([dir_out["fwd"], dir_out["bwd"]], axis=-1)
    outputs = layer_in
    hidden = jnp.stack(h_list, axis=0)
    cell = jnp.stack(c_list, axis=0)
    hp = jax.lax.Precision.HIGHEST
    hid_cat = jnp.concatenate([hidden[0::2], hidden[1::2]], axis=2)
    cel_cat = jnp.concatenate([cell[0::2], cell[1::2]], axis=2)
    hidden_out = jnp.dot(hid_cat, params["fc_w"].T, precision=hp) + params["fc_b"]
    cell_out = jnp.dot(cel_cat, params["fc_w"].T, precision=hp) + params["fc_b"]
    return outputs, (hidden_out, cell_out)


# ----------------------------------------------------------------------------
if __name__ == "__main__":
    vocab_size, emb_dim, hid_dim, n_layers = 20, 16, 32, 2
    S, B = 8, 2

    key = jax.random.PRNGKey(0)
    pkey, tkey = jax.random.split(key)
    params = init_params(pkey, vocab_size, emb_dim, hid_dim, n_layers)
    tokens = jax.random.randint(tkey, (S, B), 0, vocab_size, dtype=jnp.int32)

    fwd = jax.jit(encoder_forward)
    outputs, (hidden, cell) = fwd(params, tokens)
    jax.block_until_ready((outputs, hidden, cell))

    assert outputs.shape == (S, B, 2 * hid_dim)
    assert hidden.shape == (n_layers, B, hid_dim)
    assert cell.shape == (n_layers, B, hid_dim)

    # bf16 MXU operands (f32 accumulation / element-wise) -> ~1e-3 level error
    # vs the full-f32 reference; 1e-2 tolerance is comfortably safe.
    ref_out, (ref_h, ref_c) = encoder_ref(params, tokens)
    np.testing.assert_allclose(np.asarray(outputs), np.asarray(ref_out), rtol=1e-2, atol=1e-2)
    np.testing.assert_allclose(np.asarray(hidden), np.asarray(ref_h), rtol=1e-2, atol=1e-2)
    np.testing.assert_allclose(np.asarray(cell), np.asarray(ref_c), rtol=1e-2, atol=1e-2)

    print("KERNEL_OK")
</pallas_src>

<mosaic_0001>
module attributes {stable_mosaic.version = 11 : i64} {
  func.func @linear_kernel(%arg0: memref<16x16xf32, #tpu.memory_space<vmem>>, %arg1: memref<16x256xbf16, #tpu.memory_space<vmem>>, %arg2: memref<1x256xf32, #tpu.memory_space<vmem>>, %arg3: memref<16x256xf32, #tpu.memory_space<vmem>>) attributes {dimension_semantics = [], scalar_prefetch = 0 : i64, scratch_operands = 0 : i64, tpu.core_type = #tpu.core_type<tc>} {
    %c0 = arith.constant 0 : index
    %c0_0 = arith.constant 0 : index
    %0 = vector.load %arg0[%c0, %c0_0] : memref<16x16xf32, #tpu.memory_space<vmem>>, vector<16x16xf32>
    %1 = arith.truncf %0 : vector<16x16xf32> to vector<16x16xbf16>
    %c0_1 = arith.constant 0 : index
    %c0_2 = arith.constant 0 : index
    %2 = vector.load %arg1[%c0_1, %c0_2] : memref<16x256xbf16, #tpu.memory_space<vmem>>, vector<16x256xbf16>
    %cst = arith.constant dense<0.000000e+00> : vector<16x256xf32>
    %3 = tpu.matmul %1, %2, %cst {dimension_numbers = #tpu.dot_dimension_numbers<[1], [0], [0], [1], [0, 0, 1, 1], [], []>} : vector<16x16xbf16>, vector<16x256xbf16>, vector<16x256xf32> -> vector<16x256xf32>
    %c0_3 = arith.constant 0 : index
    %c0_4 = arith.constant 0 : index
    %4 = vector.load %arg2[%c0_3, %c0_4] : memref<1x256xf32, #tpu.memory_space<vmem>>, vector<1x256xf32>
    %5 = vector.broadcast %4 : vector<1x256xf32> to vector<16x256xf32>
    %6 = arith.addf %3, %5 : vector<16x256xf32>
    %c0_5 = arith.constant 0 : index
    %c0_6 = arith.constant 0 : index
    %7 = vector.load %arg3[%c0_5, %c0_6] : memref<16x256xf32, #tpu.memory_space<vmem>>, vector<16x256xf32>
    tpu.vector_store %arg3[%c0_5, %c0_6], %6 {strides = array<i32>} : memref<16x256xf32, #tpu.memory_space<vmem>>, vector<16x256xf32>,
    return
  }
}

module attributes {stable_mosaic.version = 11 : i64} {
  func.func @bilstm_chunk_kernel(%arg0: i32, %arg1: memref<4x2x128xf32, #tpu.memory_space<vmem>>, %arg2: memref<4x2x128xf32, #tpu.memory_space<vmem>>, %arg3: memref<2x32x128xbf16, #tpu.memory_space<vmem>>, %arg4: memref<4x2x32xf32, #tpu.memory_space<vmem>>, %arg5: memref<4x2x32xf32, #tpu.memory_space<vmem>>, %arg6: memref<2x2x32xf32, #tpu.memory_space<vmem>>, %arg7: memref<2x2x32xf32, #tpu.memory_space<vmem>>) attributes {dimension_semantics = [#tpu.dimension_semantics<arbitrary>], iteration_bounds = array<i64: 2>, scalar_prefetch = 0 : i64, scratch_operands = 0 : i64, tpu.core_type = #tpu.core_type<tc>, window_params = [{transform_indices = @transform_0, window_bounds = array<i64: 4, 2, 128>}, {transform_indices = @transform_1, window_bounds = array<i64: 4, 2, 128>}, {pipeline_mode = #tpu.pipeline_mode<synchronous>, transform_indices = @transform_2, window_bounds = array<i64: 2, 32, 128>}, {transform_indices = @transform_3, window_bounds = array<i64: 4, 2, 32>}, {transform_indices = @transform_4, window_bounds = array<i64: 4, 2, 32>}, {pipeline_mode = #tpu.pipeline_mode<synchronous>, transform_indices = @transform_5, window_bounds = array<i64: 2, 2, 32>}, {pipeline_mode = #tpu.pipeline_mode<synchronous>, transform_indices = @transform_6, window_bounds = array<i64: 2, 2, 32>}]} {
    %c0_i32 = arith.constant 0 : i32
    %0 = arith.cmpi eq, %arg0, %c0_i32 : i32
    %1 = arith.extui %0 : i1 to i32
    %c0_i32_0 = arith.constant 0 : i32
    %2 = arith.cmpi ne, %1, %c0_i32_0 : i32
    scf.if %2 {
      %cst_101 = arith.constant 0.000000e+00 : f32
      %315 = vector.broadcast %cst_101 : f32 to vector<2x2x32xf32>
      %c0_102 = arith.constant 0 : index
      %c0_103 = arith.constant 0 : index
      %c0_104 = arith.constant 0 : index
      %316 = vector.load %arg6[%c0_102, %c0_103, %c0_104] : memref<2x2x32xf32, #tpu.memory_space<vmem>>, vector<2x2x32xf32>
      tpu.vector_store %arg6[%c0_102, %c0_103, %c0_104], %315 {strides = array<i32>} : memref<2x2x32xf32, #tpu.memory_space<vmem>>, vector<2x2x32xf32>,
      %cst_105 = arith.constant 0.000000e+00 : f32
      %317 = vector.broadcast %cst_105 : f32 to vector<2x2x32xf32>
      %c0_106 = arith.constant 0 : index
      %c0_107 = arith.constant 0 : index
      %c0_108 = arith.constant 0 : index
      %318 = vector.load %arg7[%c0_106, %c0_107, %c0_108] : memref<2x2x32xf32, #tpu.memory_space<vmem>>, vector<2x2x32xf32>
      tpu.vector_store %arg7[%c0_106, %c0_107, %c0_108], %317 {strides = array<i32>} : memref<2x2x32xf32, #tpu.memory_space<vmem>>, vector<2x2x32xf32>,
    } else {
    }
    %c0 = arith.constant 0 : index
    %c0_1 = arith.constant 0 : index
    %c0_2 = arith.constant 0 : index
    %3 = vector.load %arg3[%c0, %c0_1, %c0_2] : memref<2x32x128xbf16, #tpu.memory_space<vmem>>, vector<1x32x128xbf16>
    %4 = vector.shape_cast %3 : vector<1x32x128xbf16> to vector<32x128xbf16>
    %c1 = arith.constant 1 : index
    %c0_3 = arith.constant 0 : index
    %c0_4 = arith.constant 0 : index
    %5 = vector.load %arg3[%c1, %c0_3, %c0_4] : memref<2x32x128xbf16, #tpu.memory_space<vmem>>, vector<1x32x128xbf16>
    %6 = vector.shape_cast %5 : vector<1x32x128xbf16> to vector<32x128xbf16>
    %c0_5 = arith.constant 0 : index
    %c0_6 = arith.constant 0 : index
    %c0_7 = arith.constant 0 : index
    %7 = vector.load %arg6[%c0_5, %c0_6, %c0_7] : memref<2x2x32xf32, #tpu.memory_space<vmem>>, vector<1x2x32xf32>
    %8 = vector.shape_cast %7 : vector<1x2x32xf32> to vector<2x32xf32>
    %c0_8 = arith.constant 0 : index
    %c0_9 = arith.constant 0 : index
    %c0_10 = arith.constant 0 : index
    %9 = vector.load %arg7[%c0_8, %c0_9, %c0_10] : memref<2x2x32xf32, #tpu.memory_space<vmem>>, vector<1x2x32xf32>
    %10 = vector.shape_cast %9 : vector<1x2x32xf32> to vector<2x32xf32>
    %c1_11 = arith.constant 1 : index
    %c0_12 = arith.constant 0 : index
    %c0_13 = arith.constant 0 : index
    %11 = vector.load %arg6[%c1_11, %c0_12, %c0_13] : memref<2x2x32xf32, #tpu.memory_space<vmem>>, vector<1x2x32xf32>
    %12 = vector.shape_cast %11 : vector<1x2x32xf32> to vector<2x32xf32>
    %c1_14 = arith.constant 1 : index
    %c0_15 = arith.constant 0 : index
    %c0_16 = arith.constant 0 : index
    %13 = vector.load %arg7[%c1_14, %c0_15, %c0_16] : memref<2x2x32xf32, #tpu.memory_space<vmem>>, vector<1x2x32xf32>
    %14 = vector.shape_cast %13 : vector<1x2x32xf32> to vector<2x32xf32>
    %c0_i32_17 = arith.constant 0 : i32
    %15 = arith.truncf %8 : vector<2x32xf32> to vector<2x32xbf16>
    %cst = arith.constant dense<0.000000e+00> : vector<2x128xf32>
    %16 = tpu.matmul %15, %4, %cst {dimension_numbers = #tpu.dot_dimension_numbers<[1], [0], [0], [1], [0, 0, 1, 1], [], []>} : vector<2x32xbf16>, vector<32x128xbf16>, vector<2x128xf32> -> vector<2x128xf32>
    %17 = arith.truncf %12 : vector<2x32xf32> to vector<2x32xbf16>
    %cst_18 = arith.constant dense<0.000000e+00> : vector<2x128xf32>
    %18 = tpu.matmul %17, %6, %cst_18 {dimension_numbers = #tpu.dot_dimension_numbers<[1], [0], [0], [1], [0, 0, 1, 1], [], []>} : vector<2x32xbf16>, vector<32x128xbf16>, vector<2x128xf32> -> vector<2x128xf32>
    %19 = arith.index_cast %c0_i32_17 : i32 to index
    %c0_19 = arith.constant 0 : index
    %c0_20 = arith.constant 0 : index
    %20 = vector.load %arg1[%19, %c0_19, %c0_20] : memref<4x2x128xf32, #tpu.memory_space<vmem>>, vector<1x2x128xf32>
    %21 = vector.shape_cast %20 : vector<1x2x128xf32> to vector<2x128xf32>
    %22 = arith.addf %16, %21 : vector<2x128xf32>
    %23 = vector.extract_strided_slice %22 {offsets = [0, 0], sizes = [2, 32], strides = [1, 1]} : vector<2x128xf32> to vector<2x32xf32>
    %24 = arith.negf %23 : vector<2x32xf32>
    %25 = math.exp %24 : vector<2x32xf32>
    %cst_21 = arith.constant 1.000000e+00 : f32
    %26 = vector.broadcast %cst_21 : f32 to vector<2x32xf32>
    %27 = arith.addf %26, %25 : vector<2x32xf32>
    %28 = arith.divf %26, %27 : vector<2x32xf32>
    %29 = vector.extract_strided_slice %22 {offsets = [0, 32], sizes = [2, 32], strides = [1, 1]} : vector<2x128xf32> to vector<2x32xf32>
    %30 = arith.negf %29 : vector<2x32xf32>
    %31 = math.exp %30 : vector<2x32xf32>
    %cst_22 = arith.constant 1.000000e+00 : f32
    %32 = vector.broadcast %cst_22 : f32 to vector<2x32xf32>
    %33 = arith.addf %32, %31 : vector<2x32xf32>
    %34 = arith.divf %32, %33 : vector<2x32xf32>
    %35 = vector.extract_strided_slice %22 {offsets = [0, 64], sizes = [2, 32], strides = [1, 1]} : vector<2x128xf32> to vector<2x32xf32>
    %36 = math.tanh %35 : vector<2x32xf32>
    %37 = vector.extract_strided_slice %22 {offsets = [0, 96], sizes = [2, 32], strides = [1, 1]} : vector<2x128xf32> to vector<2x32xf32>
    %38 = arith.negf %37 : vector<2x32xf32>
    %39 = math.exp %38 : vector<2x32xf32>
    %cst_23 = arith.constant 1.000000e+00 : f32
    %40 = vector.broadcast %cst_23 : f32 to vector<2x32xf32>
    %41 = arith.addf %40, %39 : vector<2x32xf32>
    %42 = arith.divf %40, %41 : vector<2x32xf32>
    %43 = arith.mulf %34, %10 : vector<2x32xf32>
    %44 = arith.mulf %28, %36 : vector<2x32xf32>
    %45 = arith.addf %43, %44 : vector<2x32xf32>
    %46 = math.tanh %45 : vector<2x32xf32>
    %47 = arith.mulf %42, %46 : vector<2x32xf32>
    %c3_i32 = arith.constant 3 : i32
    %48 = arith.subi %c3_i32, %c0_i32_17 : i32
    %49 = arith.index_cast %48 : i32 to index
    %c0_24 = arith.constant 0 : index
    %c0_25 = arith.constant 0 : index
    %50 = vector.load %arg2[%49, %c0_24, %c0_25] : memref<4x2x128xf32, #tpu.memory_space<vmem>>, vector<1x2x128xf32>
    %51 = vector.shape_cast %50 : vector<1x2x128xf32> to vector<2x128xf32>
    %52 = arith.addf %18, %51 : vector<2x128xf32>
    %53 = vector.extract_strided_slice %52 {offsets = [0, 0], sizes = [2, 32], strides = [1, 1]} : vector<2x128xf32> to vector<2x32xf32>
    %54 = arith.negf %53 : vector<2x32xf32>
    %55 = math.exp %54 : vector<2x32xf32>
    %cst_26 = arith.constant 1.000000e+00 : f32
    %56 = vector.broadcast %cst_26 : f32 to vector<2x32xf32>
    %57 = arith.addf %56, %55 : vector<2x32xf32>
    %58 = arith.divf %56, %57 : vector<2x32xf32>
    %59 = vector.extract_strided_slice %52 {offsets = [0, 32], sizes = [2, 32], strides = [1, 1]} : vector<2x128xf32> to vector<2x32xf32>
    %60 = arith.negf %59 : vector<2x32xf32>
    %61 = math.exp %60 : vector<2x32xf32>
    %cst_27 = arith.constant 1.000000e+00 : f32
    %62 = vector.broadcast %cst_27 : f32 to vector<2x32xf32>
    %63 = arith.addf %62, %61 : vector<2x32xf32>
    %64 = arith.divf %62, %63 : vector<2x32xf32>
    %65 = vector.extract_strided_slice %52 {offsets = [0, 64], sizes = [2, 32], strides = [1, 1]} : vector<2x128xf32> to vector<2x32xf32>
    %66 = math.tanh %65 : vector<2x32xf32>
    %67 = vector.extract_strided_slice %52 {offsets = [0, 96], sizes = [2, 32], strides = [1, 1]} : vector<2x128xf32> to vector<2x32xf32>
    %68 = arith.negf %67 : vector<2x32xf32>
    %69 = math.exp %68 : vector<2x32xf32>
    %cst_28 = arith.constant 1.000000e+00 : f32
    %70 = vector.broadcast %cst_28 : f32 to vector<2x32xf32>
    %71 = arith.addf %70, %69 : vector<2x32xf32>
    %72 = arith.divf %70, %71 : vector<2x32xf32>
    %73 = arith.mulf %64, %14 : vector<2x32xf32>
    %74 = arith.mulf %58, %66 : vector<2x32xf32>
    %75 = arith.addf %73, %74 : vector<2x32xf32>
    %76 = math.tanh %75 : vector<2x32xf32>
    %77 = arith.mulf %72, %76 : vector<2x32xf32>
    %78 = arith.index_cast %c0_i32_17 : i32 to index
    %c0_29 = arith.constant 0 : index
    %c0_30 = arith.constant 0 : index
    %79 = vector.load %arg4[%78, %c0_29, %c0_30] : memref<4x2x32xf32, #tpu.memory_space<vmem>>, vector<1x2x32xf32>
    %80 = vector.shape_cast %79 : vector<1x2x32xf32> to vector<2x32xf32>
    %81 = vector.shape_cast %47 : vector<2x32xf32> to vector<1x2x32xf32>
    tpu.vector_store %arg4[%78, %c0_29, %c0_30], %81 {strides = array<i32>} : memref<4x2x32xf32, #tpu.memory_space<vmem>>, vector<1x2x32xf32>,
    %c3_i32_31 = arith.constant 3 : i32
    %82 = arith.subi %c3_i32_31, %c0_i32_17 : i32
    %83 = arith.index_cast %82 : i32 to index
    %c0_32 = arith.constant 0 : index
    %c0_33 = arith.constant 0 : index
    %84 = vector.load %arg5[%83, %c0_32, %c0_33] : memref<4x2x32xf32, #tpu.memory_space<vmem>>, vector<1x2x32xf32>
    %85 = vector.shape_cast %84 : vector<1x2x32xf32> to vector<2x32xf32>
    %86 = vector.shape_cast %77 : vector<2x32xf32> to vector<1x2x32xf32>
    tpu.vector_store %arg5[%83, %c0_32, %c0_33], %86 {strides = array<i32>} : memref<4x2x32xf32, #tpu.memory_space<vmem>>, vector<1x2x32xf32>,
    %c1_i32 = arith.constant 1 : i32
    %87 = arith.truncf %47 : vector<2x32xf32> to vector<2x32xbf16>
    %cst_34 = arith.constant dense<0.000000e+00> : vector<2x128xf32>
    %88 = tpu.matmul %87, %4, %cst_34 {dimension_numbers = #tpu.dot_dimension_numbers<[1], [0], [0], [1], [0, 0, 1, 1], [], []>} : vector<2x32xbf16>, vector<32x128xbf16>, vector<2x128xf32> -> vector<2x128xf32>
    %89 = arith.truncf %77 : vector<2x32xf32> to vector<2x32xbf16>
    %cst_35 = arith.constant dense<0.000000e+00> : vector<2x128xf32>
    %90 = tpu.matmul %89, %6, %cst_35 {dimension_numbers = #tpu.dot_dimension_numbers<[1], [0], [0], [1], [0, 0, 1, 1], [], []>} : vector<2x32xbf16>, vector<32x128xbf16>, vector<2x128xf32> -> vector<2x128xf32>
    %91 = arith.index_cast %c1_i32 : i32 to index
    %c0_36 = arith.constant 0 : index
    %c0_37 = arith.constant 0 : index
    %92 = vector.load %arg1[%91, %c0_36, %c0_37] : memref<4x2x128xf32, #tpu.memory_space<vmem>>, vector<1x2x128xf32>
    %93 = vector.shape_cast %92 : vector<1x2x128xf32> to vector<2x128xf32>
    %94 = arith.addf %88, %93 : vector<2x128xf32>
    %95 = vector.extract_strided_slice %94 {offsets = [0, 0], sizes = [2, 32], strides = [1, 1]} : vector<2x128xf32> to vector<2x32xf32>
    %96 = arith.negf %95 : vector<2x32xf32>
    %97 = math.exp %96 : vector<2x32xf32>
    %cst_38 = arith.constant 1.000000e+00 : f32
    %98 = vector.broadcast %cst_38 : f32 to vector<2x32xf32>
    %99 = arith.addf %98, %97 : vector<2x32xf32>
    %100 = arith.divf %98, %99 : vector<2x32xf32>
    %101 = vector.extract_strided_slice %94 {offsets = [0, 32], sizes = [2, 32], strides = [1, 1]} : vector<2x128xf32> to vector<2x32xf32>
    %102 = arith.negf %101 : vector<2x32xf32>
    %103 = math.exp %102 : vector<2x32xf32>
    %cst_39 = arith.constant 1.000000e+00 : f32
    %104 = vector.broadcast %cst_39 : f32 to vector<2x32xf32>
    %105 = arith.addf %104, %103 : vector<2x32xf32>
    %106 = arith.divf %104, %105 : vector<2x32xf32>
    %107 = vector.extract_strided_slice %94 {offsets = [0, 64], sizes = [2, 32], strides = [1, 1]} : vector<2x128xf32> to vector<2x32xf32>
    %108 = math.tanh %107 : vector<2x32xf32>
    %109 = vector.extract_strided_slice %94 {offsets = [0, 96], sizes = [2, 32], strides = [1, 1]} : vector<2x128xf32> to vector<2x32xf32>
    %110 = arith.negf %109 : vector<2x32xf32>
    %111 = math.exp %110 : vector<2x32xf32>
    %cst_40 = arith.constant 1.000000e+00 : f32
    %112 = vector.broadcast %cst_40 : f32 to vector<2x32xf32>
    %113 = arith.addf %112, %111 : vector<2x32xf32>
    %114 = arith.divf %112, %113 : vector<2x32xf32>
    %115 = arith.mulf %106, %45 : vector<2x32xf32>
    %116 = arith.mulf %100, %108 : vector<2x32xf32>
    %117 = arith.addf %115, %116 : vector<2x32xf32>
    %118 = math.tanh %117 : vector<2x32xf32>
    %119 = arith.mulf %114, %118 : vector<2x32xf32>
    %c3_i32_41 = arith.constant 3 : i32
    %120 = arith.subi %c3_i32_41, %c1_i32 : i32
    %121 = arith.index_cast %120 : i32 to index
    %c0_42 = arith.constant 0 : index
    %c0_43 = arith.constant 0 : index
    %122 = vector.load %arg2[%121, %c0_42, %c0_43] : memref<4x2x128xf32, #tpu.memory_space<vmem>>, vector<1x2x128xf32>
    %123 = vector.shape_cast %122 : vector<1x2x128xf32> to vector<2x128xf32>
    %124 = arith.addf %90, %123 : vector<2x128xf32>
    %125 = vector.extract_strided_slice %124 {offsets = [0, 0], sizes = [2, 32], strides = [1, 1]} : vector<2x128xf32> to vector<2x32xf32>
    %126 = arith.negf %125 : vector<2x32xf32>
    %127 = math.exp %126 : vector<2x32xf32>
    %cst_44 = arith.constant 1.000000e+00 : f32
    %128 = vector.broadcast %cst_44 : f32 to vector<2x32xf32>
    %129 = arith.addf %128, %127 : vector<2x32xf32>
    %130 = arith.divf %128, %129 : vector<2x32xf32>
    %131 = vector.extract_strided_slice %124 {offsets = [0, 32], sizes = [2, 32], strides = [1, 1]} : vector<2x128xf32> to vector<2x32xf32>
    %132 = arith.negf %131 : vector<2x32xf32>
    %133 = math.exp %132 : vector<2x32xf32>
    %cst_45 = arith.constant 1.000000e+00 : f32
    %134 = vector.broadcast %cst_45 : f32 to vector<2x32xf32>
    %135 = arith.addf %134, %133 : vector<2x32xf32>
    %136 = arith.divf %134, %135 : vector<2x32xf32>
    %137 = vector.extract_strided_slice %124 {offsets = [0, 64], sizes = [2, 32], strides = [1, 1]} : vector<2x128xf32> to vector<2x32xf32>
    %138 = math.tanh %137 : vector<2x32xf32>
    %139 = vector.extract_strided_slice %124 {offsets = [0, 96], sizes = [2, 32], strides = [1, 1]} : vector<2x128xf32> to vector<2x32xf32>
    %140 = arith.negf %139 : vector<2x32xf32>
    %141 = math.exp %140 : vector<2x32xf32>
    %cst_46 = arith.constant 1.000000e+00 : f32
    %142 = vector.broadcast %cst_46 : f32 to vector<2x32xf32>
    %143 = arith.addf %142, %141 : vector<2x32xf32>
    %144 = arith.divf %142, %143 : vector<2x32xf32>
    %145 = arith.mulf %136, %75 : vector<2x32xf32>
    %146 = arith.mulf %130, %138 : vector<2x32xf32>
    %147 = arith.addf %145, %146 : vector<2x32xf32>
    %148 = math.tanh %147 : vector<2x32xf32>
    %149 = arith.mulf %144, %148 : vector<2x32xf32>
    %150 = arith.index_cast %c1_i32 : i32 to index
    %c0_47 = arith.constant 0 : index
    %c0_48 = arith.constant 0 : index
    %151 = vector.load %arg4[%150, %c0_47, %c0_48] : memref<4x2x32xf32, #tpu.memory_space<vmem>>, vector<1x2x32xf32>
    %152 = vector.shape_cast %151 : vector<1x2x32xf32> to vector<2x32xf32>
    %153 = vector.shape_cast %119 : vector<2x32xf32> to vector<1x2x32xf32>
    tpu.vector_store %arg4[%150, %c0_47, %c0_48], %153 {strides = array<i32>} : memref<4x2x32xf32, #tpu.memory_space<vmem>>, vector<1x2x32xf32>,
    %c3_i32_49 = arith.constant 3 : i32
    %154 = arith.subi %c3_i32_49, %c1_i32 : i32
    %155 = arith.index_cast %154 : i32 to index
    %c0_50 = arith.constant 0 : index
    %c0_51 = arith.constant 0 : index
    %156 = vector.load %arg5[%155, %c0_50, %c0_51] : memref<4x2x32xf32, #tpu.memory_space<vmem>>, vector<1x2x32xf32>
    %157 = vector.shape_cast %156 : vector<1x2x32xf32> to vector<2x32xf32>
    %158 = vector.shape_cast %149 : vector<2x32xf32> to vector<1x2x32xf32>
    tpu.vector_store %arg5[%155, %c0_50, %c0_51], %158 {strides = array<i32>} : memref<4x2x32xf32, #tpu.memory_space<vmem>>, vector<1x2x32xf32>,
    %c2_i32 = arith.constant 2 : i32
    %159 = arith.truncf %119 : vector<2x32xf32> to vector<2x32xbf16>
    %cst_52 = arith.constant dense<0.000000e+00> : vector<2x128xf32>
    %160 = tpu.matmul %159, %4, %cst_52 {dimension_numbers = #tpu.dot_dimension_numbers<[1], [0], [0], [1], [0, 0, 1, 1], [], []>} : vector<2x32xbf16>, vector<32x128xbf16>, vector<2x128xf32> -> vector<2x128xf32>
    %161 = arith.truncf %149 : vector<2x32xf32> to vector<2x32xbf16>
    %cst_53 = arith.constant dense<0.000000e+00> : vector<2x128xf32>
    %162 = tpu.matmul %161, %6, %cst_53 {dimension_numbers = #tpu.dot_dimension_numbers<[1], [0], [0], [1], [0, 0, 1, 1], [], []>} : vector<2x32xbf16>, vector<32x128xbf16>, vector<2x128xf32> -> vector<2x128xf32>
    %163 = arith.index_cast %c2_i32 : i32 to index
    %c0_54 = arith.constant 0 : index
    %c0_55 = arith.constant 0 : index
    %164 = vector.load %arg1[%163, %c0_54, %c0_55] : memref<4x2x128xf32, #tpu.memory_space<vmem>>, vector<1x2x128xf32>
    %165 = vector.shape_cast %164 : vector<1x2x128xf32> to vector<2x128xf32>
    %166 = arith.addf %160, %165 : vector<2x128xf32>
    %167 = vector.extract_strided_slice %166 {offsets = [0, 0], sizes = [2, 32], strides = [1, 1]} : vector<2x128xf32> to vector<2x32xf32>
    %168 = arith.negf %167 : vector<2x32xf32>
    %169 = math.exp %168 : vector<2x32xf32>
    %cst_56 = arith.constant 1.000000e+00 : f32
    %170 = vector.broadcast %cst_56 : f32 to vector<2x32xf32>
    %171 = arith.addf %170, %169 : vector<2x32xf32>
    %172 = arith.divf %170, %171 : vector<2x32xf32>
    %173 = vector.extract_strided_slice %166 {offsets = [0, 32], sizes = [2, 32], strides = [1, 1]} : vector<2x128xf32> to vector<2x32xf32>
    %174 = arith.negf %173 : vector<2x32xf32>
    %175 = math.exp %174 : vector<2x32xf32>
    %cst_57 = arith.constant 1.000000e+00 : f32
    %176 = vector.broadcast %cst_57 : f32 to vector<2x32xf32>
    %177 = arith.addf %176, %175 : vector<2x32xf32>
    %178 = arith.divf %176, %177 : vector<2x32xf32>
    %179 = vector.extract_strided_slice %166 {offsets = [0, 64], sizes = [2, 32], strides = [1, 1]} : vector<2x128xf32> to vector<2x32xf32>
    %180 = math.tanh %179 : vector<2x32xf32>
    %181 = vector.extract_strided_slice %166 {offsets = [0, 96], sizes = [2, 32], strides = [1, 1]} : vector<2x128xf32> to vector<2x32xf32>
    %182 = arith.negf %181 : vector<2x32xf32>
    %183 = math.exp %182 : vector<2x32xf32>
    %cst_58 = arith.constant 1.000000e+00 : f32
    %184 = vector.broadcast %cst_58 : f32 to vector<2x32xf32>
    %185 = arith.addf %184, %183 : vector<2x32xf32>
    %186 = arith.divf %184, %185 : vector<2x32xf32>
    %187 = arith.mulf %178, %117 : vector<2x32xf32>
    %188 = arith.mulf %172, %180 : vector<2x32xf32>
    %189 = arith.addf %187, %188 : vector<2x32xf32>
    %190 = math.tanh %189 : vector<2x32xf32>
    %191 = arith.mulf %186, %190 : vector<2x32xf32>
    %c3_i32_59 = arith.constant 3 : i32
    %192 = arith.subi %c3_i32_59, %c2_i32 : i32
    %193 = arith.index_cast %192 : i32 to index
    %c0_60 = arith.constant 0 : index
    %c0_61 = arith.constant 0 : index
    %194 = vector.load %arg2[%193, %c0_60, %c0_61] : memref<4x2x128xf32, #tpu.memory_space<vmem>>, vector<1x2x128xf32>
    %195 = vector.shape_cast %194 : vector<1x2x128xf32> to vector<2x128xf32>
    %196 = arith.addf %162, %195 : vector<2x128xf32>
    %197 = vector.extract_strided_slice %196 {offsets = [0, 0], sizes = [2, 32], strides = [1, 1]} : vector<2x128xf32> to vector<2x32xf32>
    %198 = arith.negf %197 : vector<2x32xf32>
    %199 = math.exp %198 : vector<2x32xf32>
    %cst_62 = arith.constant 1.000000e+00 : f32
    %200 = vector.broadcast %cst_62 : f32 to vector<2x32xf32>
    %201 = arith.addf %200, %199 : vector<2x32xf32>
    %202 = arith.divf %200, %201 : vector<2x32xf32>
    %203 = vector.extract_strided_slice %196 {offsets = [0, 32], sizes = [2, 32], strides = [1, 1]} : vector<2x128xf32> to vector<2x32xf32>
    %204 = arith.negf %203 : vector<2x32xf32>
    %205 = math.exp %204 : vector<2x32xf32>
    %cst_63 = arith.constant 1.000000e+00 : f32
    %206 = vector.broadcast %cst_63 : f32 to vector<2x32xf32>
    %207 = arith.addf %206, %205 : vector<2x32xf32>
    %208 = arith.divf %206, %207 : vector<2x32xf32>
    %209 = vector.extract_strided_slice %196 {offsets = [0, 64], sizes = [2, 32], strides = [1, 1]} : vector<2x128xf32> to vector<2x32xf32>
    %210 = math.tanh %209 : vector<2x32xf32>
    %211 = vector.extract_strided_slice %196 {offsets = [0, 96], sizes = [2, 32], strides = [1, 1]} : vector<2x128xf32> to vector<2x32xf32>
    %212 = arith.negf %211 : vector<2x32xf32>
    %213 = math.exp %212 : vector<2x32xf32>
    %cst_64 = arith.constant 1.000000e+00 : f32
    %214 = vector.broadcast %cst_64 : f32 to vector<2x32xf32>
    %215 = arith.addf %214, %213 : vector<2x32xf32>
    %216 = arith.divf %214, %215 : vector<2x32xf32>
    %217 = arith.mulf %208, %147 : vector<2x32xf32>
    %218 = arith.mulf %202, %210 : vector<2x32xf32>
    %219 = arith.addf %217, %218 : vector<2x32xf32>
    %220 = math.tanh %219 : vector<2x32xf32>
    %221 = arith.mulf %216, %220 : vector<2x32xf32>
    %222 = arith.index_cast %c2_i32 : i32 to index
    %c0_65 = arith.constant 0 : index
    %c0_66 = arith.constant 0 : index
    %223 = vector.load %arg4[%222, %c0_65, %c0_66] : memref<4x2x32xf32, #tpu.memory_space<vmem>>, vector<1x2x32xf32>
    %224 = vector.shape_cast %223 : vector<1x2x32xf32> to vector<2x32xf32>
    %225 = vector.shape_cast %191 : vector<2x32xf32> to vector<1x2x32xf32>
    tpu.vector_store %arg4[%222, %c0_65, %c0_66], %225 {strides = array<i32>} : memref<4x2x32xf32, #tpu.memory_space<vmem>>, vector<1x2x32xf32>,
    %c3_i32_67 = arith.constant 3 : i32
    %226 = arith.subi %c3_i32_67, %c2_i32 : i32
    %227 = arith.index_cast %226 : i32 to index
    %c0_68 = arith.constant 0 : index
    %c0_69 = arith.constant 0 : index
    %228 = vector.load %arg5[%227, %c0_68, %c0_69] : memref<4x2x32xf32, #tpu.memory_space<vmem>>, vector<1x2x32xf32>
    %229 = vector.shape_cast %228 : vector<1x2x32xf32> to vector<2x32xf32>
    %230 = vector.shape_cast %221 : vector<2x32xf32> to vector<1x2x32xf32>
    tpu.vector_store %arg5[%227, %c0_68, %c0_69], %230 {strides = array<i32>} : memref<4x2x32xf32, #tpu.memory_space<vmem>>, vector<1x2x32xf32>,
    %c3_i32_70 = arith.constant 3 : i32
    %231 = arith.truncf %191 : vector<2x32xf32> to vector<2x32xbf16>
    %cst_71 = arith.constant dense<0.000000e+00> : vector<2x128xf32>
    %232 = tpu.matmul %231, %4, %cst_71 {dimension_numbers = #tpu.dot_dimension_numbers<[1], [0], [0], [1], [0, 0, 1, 1], [], []>} : vector<2x32xbf16>, vector<32x128xbf16>, vector<2x128xf32> -> vector<2x128xf32>
    %233 = arith.truncf %221 : vector<2x32xf32> to vector<2x32xbf16>
    %cst_72 = arith.constant dense<0.000000e+00> : vector<2x128xf32>
    %234 = tpu.matmul %233, %6, %cst_72 {dimension_numbers = #tpu.dot_dimension_numbers<[1], [0], [0], [1], [0, 0, 1, 1], [], []>} : vector<2x32xbf16>, vector<32x128xbf16>, vector<2x128xf32> -> vector<2x128xf32>
    %235 = arith.index_cast %c3_i32_70 : i32 to index
    %c0_73 = arith.constant 0 : index
    %c0_74 = arith.constant 0 : index
    %236 = vector.load %arg1[%235, %c0_73, %c0_74] : memref<4x2x128xf32, #tpu.memory_space<vmem>>, vector<1x2x128xf32>
    %237 = vector.shape_cast %236 : vector<1x2x128xf32> to vector<2x128xf32>
    %238 = arith.addf %232, %237 : vector<2x128xf32>
    %239 = vector.extract_strided_slice %238 {offsets = [0, 0], sizes = [2, 32], strides = [1, 1]} : vector<2x128xf32> to vector<2x32xf32>
    %240 = arith.negf %239 : vector<2x32xf32>
    %241 = math.exp %240 : vector<2x32xf32>
    %cst_75 = arith.constant 1.000000e+00 : f32
    %242 = vector.broadcast %cst_75 : f32 to vector<2x32xf32>
    %243 = arith.addf %242, %241 : vector<2x32xf32>
    %244 = arith.divf %242, %243 : vector<2x32xf32>
    %245 = vector.extract_strided_slice %238 {offsets = [0, 32], sizes = [2, 32], strides = [1, 1]} : vector<2x128xf32> to vector<2x32xf32>
    %246 = arith.negf %245 : vector<2x32xf32>
    %247 = math.exp %246 : vector<2x32xf32>
    %cst_76 = arith.constant 1.000000e+00 : f32
    %248 = vector.broadcast %cst_76 : f32 to vector<2x32xf32>
    %249 = arith.addf %248, %247 : vector<2x32xf32>
    %250 = arith.divf %248, %249 : vector<2x32xf32>
    %251 = vector.extract_strided_slice %238 {offsets = [0, 64], sizes = [2, 32], strides = [1, 1]} : vector<2x128xf32> to vector<2x32xf32>
    %252 = math.tanh %251 : vector<2x32xf32>
    %253 = vector.extract_strided_slice %238 {offsets = [0, 96], sizes = [2, 32], strides = [1, 1]} : vector<2x128xf32> to vector<2x32xf32>
    %254 = arith.negf %253 : vector<2x32xf32>
    %255 = math.exp %254 : vector<2x32xf32>
    %cst_77 = arith.constant 1.000000e+00 : f32
    %256 = vector.broadcast %cst_77 : f32 to vector<2x32xf32>
    %257 = arith.addf %256, %255 : vector<2x32xf32>
    %258 = arith.divf %256, %257 : vector<2x32xf32>
    %259 = arith.mulf %250, %189 : vector<2x32xf32>
    %260 = arith.mulf %244, %252 : vector<2x32xf32>
    %261 = arith.addf %259, %260 : vector<2x32xf32>
    %262 = math.tanh %261 : vector<2x32xf32>
    %263 = arith.mulf %258, %262 : vector<2x32xf32>
    %c3_i32_78 = arith.constant 3 : i32
    %264 = arith.subi %c3_i32_78, %c3_i32_70 : i32
    %265 = arith.index_cast %264 : i32 to index
    %c0_79 = arith.constant 0 : index
    %c0_80 = arith.constant 0 : index
    %266 = vector.load %arg2[%265, %c0_79, %c0_80] : memref<4x2x128xf32, #tpu.memory_space<vmem>>, vector<1x2x128xf32>
    %267 = vector.shape_cast %266 : vector<1x2x128xf32> to vector<2x128xf32>
    %268 = arith.addf %234, %267 : vector<2x128xf32>
    %269 = vector.extract_strided_slice %268 {offsets = [0, 0], sizes = [2, 32], strides = [1, 1]} : vector<2x128xf32> to vector<2x32xf32>
    %270 = arith.negf %269 : vector<2x32xf32>
    %271 = math.exp %270 : vector<2x32xf32>
    %cst_81 = arith.constant 1.000000e+00 : f32
    %272 = vector.broadcast %cst_81 : f32 to vector<2x32xf32>
    %273 = arith.addf %272, %271 : vector<2x32xf32>
    %274 = arith.divf %272, %273 : vector<2x32xf32>
    %275 = vector.extract_strided_slice %268 {offsets = [0, 32], sizes = [2, 32], strides = [1, 1]} : vector<2x128xf32> to vector<2x32xf32>
    %276 = arith.negf %275 : vector<2x32xf32>
    %277 = math.exp %276 : vector<2x32xf32>
    %cst_82 = arith.constant 1.000000e+00 : f32
    %278 = vector.broadcast %cst_82 : f32 to vector<2x32xf32>
    %279 = arith.addf %278, %277 : vector<2x32xf32>
    %280 = arith.divf %278, %279 : vector<2x32xf32>
    %281 = vector.extract_strided_slice %268 {offsets = [0, 64], sizes = [2, 32], strides = [1, 1]} : vector<2x128xf32> to vector<2x32xf32>
    %282 = math.tanh %281 : vector<2x32xf32>
    %283 = vector.extract_strided_slice %268 {offsets = [0, 96], sizes = [2, 32], strides = [1, 1]} : vector<2x128xf32> to vector<2x32xf32>
    %284 = arith.negf %283 : vector<2x32xf32>
    %285 = math.exp %284 : vector<2x32xf32>
    %cst_83 = arith.constant 1.000000e+00 : f32
    %286 = vector.broadcast %cst_83 : f32 to vector<2x32xf32>
    %287 = arith.addf %286, %285 : vector<2x32xf32>
    %288 = arith.divf %286, %287 : vector<2x32xf32>
    %289 = arith.mulf %280, %219 : vector<2x32xf32>
    %290 = arith.mulf %274, %282 : vector<2x32xf32>
    %291 = arith.addf %289, %290 : vector<2x32xf32>
    %292 = math.tanh %291 : vector<2x32xf32>
    %293 = arith.mulf %288, %292 : vector<2x32xf32>
    %294 = arith.index_cast %c3_i32_70 : i32 to index
    %c0_84 = arith.constant 0 : index
    %c0_85 = arith.constant 0 : index
    %295 = vector.load %arg4[%294, %c0_84, %c0_85] : memref<4x2x32xf32, #tpu.memory_space<vmem>>, vector<1x2x32xf32>
    %296 = vector.shape_cast %295 : vector<1x2x32xf32> to vector<2x32xf32>
    %297 = vector.shape_cast %263 : vector<2x32xf32> to vector<1x2x32xf32>
    tpu.vector_store %arg4[%294, %c0_84, %c0_85], %297 {strides = array<i32>} : memref<4x2x32xf32, #tpu.memory_space<vmem>>, vector<1x2x32xf32>,
    %c3_i32_86 = arith.constant 3 : i32
    %298 = arith.subi %c3_i32_86, %c3_i32_70 : i32
    %299 = arith.index_cast %298 : i32 to index
    %c0_87 = arith.constant 0 : index
    %c0_88 = arith.constant 0 : index
    %300 = vector.load %arg5[%299, %c0_87, %c0_88] : memref<4x2x32xf32, #tpu.memory_space<vmem>>, vector<1x2x32xf32>
    %301 = vector.shape_cast %300 : vector<1x2x32xf32> to vector<2x32xf32>
    %302 = vector.shape_cast %293 : vector<2x32xf32> to vector<1x2x32xf32>
    tpu.vector_store %arg5[%299, %c0_87, %c0_88], %302 {strides = array<i32>} : memref<4x2x32xf32, #tpu.memory_space<vmem>>, vector<1x2x32xf32>,
    %c4_i32 = arith.constant 4 : i32
    %c0_89 = arith.constant 0 : index
    %c0_90 = arith.constant 0 : index
    %c0_91 = arith.constant 0 : index
    %303 = vector.load %arg6[%c0_89, %c0_90, %c0_91] : memref<2x2x32xf32, #tpu.memory_space<vmem>>, vector<1x2x32xf32>
    %304 = vector.shape_cast %303 : vector<1x2x32xf32> to vector<2x32xf32>
    %305 = vector.shape_cast %263 : vector<2x32xf32> to vector<1x2x32xf32>
    tpu.vector_store %arg6[%c0_89, %c0_90, %c0_91], %305 {strides = array<i32>} : memref<2x2x32xf32, #tpu.memory_space<vmem>>, vector<1x2x32xf32>,
    %c1_92 = arith.constant 1 : index
    %c0_93 = arith.constant 0 : index
    %c0_94 = arith.constant 0 : index
    %306 = vector.load %arg6[%c1_92, %c0_93, %c0_94] : memref<2x2x32xf32, #tpu.memory_space<vmem>>, vector<1x2x32xf32>
    %307 = vector.shape_cast %306 : vector<1x2x32xf32> to vector<2x32xf32>
    %308 = vector.shape_cast %293 : vector<2x32xf32> to vector<1x2x32xf32>
    tpu.vector_store %arg6[%c1_92, %c0_93, %c0_94], %308 {strides = array<i32>} : memref<2x2x32xf32, #tpu.memory_space<vmem>>, vector<1x2x32xf32>,
    %c0_95 = arith.constant 0 : index
    %c0_96 = arith.constant 0 : index
    %c0_97 = arith.constant 0 : index
    %309 = vector.load %arg7[%c0_95, %c0_96, %c0_97] : memref<2x2x32xf32, #tpu.memory_space<vmem>>, vector<1x2x32xf32>
    %310 = vector.shape_cast %309 : vector<1x2x32xf32> to vector<2x32xf32>
    %311 = vector.shape_cast %261 : vector<2x32xf32> to vector<1x2x32xf32>
    tpu.vector_store %arg7[%c0_95, %c0_96, %c0_97], %311 {strides = array<i32>} : memref<2x2x32xf32, #tpu.memory_space<vmem>>, vector<1x2x32xf32>,
    %c1_98 = arith.constant 1 : index
    %c0_99 = arith.constant 0 : index
    %c0_100 = arith.constant 0 : index
    %312 = vector.load %arg7[%c1_98, %c0_99, %c0_100] : memref<2x2x32xf32, #tpu.memory_space<vmem>>, vector<1x2x32xf32>
    %313 = vector.shape_cast %312 : vector<1x2x32xf32> to vector<2x32xf32>
    %314 = vector.shape_cast %291 : vector<2x32xf32> to vector<1x2x32xf32>
    tpu.vector_store %arg7[%c1_98, %c0_99, %c0_100], %314 {strides = array<i32>} : memref<2x2x32xf32, #tpu.memory_space<vmem>>, vector<1x2x32xf32>,
    return
  }
  func.func @transform_0(%arg0: i32) -> (i32, i32, i32) {
    %c0_i32 = arith.constant 0 : i32
    %c0_i32_0 = arith.constant 0 : i32
    %c0_i32_1 = arith.constant 0 : i32
    return %arg0, %c0_i32, %c0_i32_0 : i32, i32, i32
  }
  func.func @transform_1(%arg0: i32) -> (i32, i32, i32) {
    %c1_i32 = arith.constant 1 : i32
    %0 = arith.subi %c1_i32, %arg0 : i32
    %c0_i32 = arith.constant 0 : i32
    %c0_i32_0 = arith.constant 0 : i32
    %c0_i32_1 = arith.constant 0 : i32
    return %0, %c0_i32, %c0_i32_0 : i32, i32, i32
  }
  func.func @transform_2(%arg0: i32) -> (i32, i32, i32) {
    %c0_i32 = arith.constant 0 : i32
    %c0_i32_0 = arith.constant 0 : i32
    %c0_i32_1 = arith.constant 0 : i32
    %c0_i32_2 = arith.constant 0 : i32
    return %c0_i32, %c0_i32_0, %c0_i32_1 : i32, i32, i32
  }
  func.func @transform_3(%arg0: i32) -> (i32, i32, i32) {
    %c0_i32 = arith.constant 0 : i32
    %c0_i32_0 = arith.constant 0 : i32
    %c0_i32_1 = arith.constant 0 : i32
    return %arg0, %c0_i32, %c0_i32_0 : i32, i32, i32
  }
  func.func @transform_4(%arg0: i32) -> (i32, i32, i32) {
    %c1_i32 = arith.constant 1 : i32
    %0 = arith.subi %c1_i32, %arg0 : i32
    %c0_i32 = arith.constant 0 : i32
    %c0_i32_0 = arith.constant 0 : i32
    %c0_i32_1 = arith.constant 0 : i32
    return %0, %c0_i32, %c0_i32_0 : i32, i32, i32
  }
  func.func @transform_5(%arg0: i32) -> (i32, i32, i32) {
    %c0_i32 = arith.constant 0 : i32
    %c0_i32_0 = arith.constant 0 : i32
    %c0_i32_1 = arith.constant 0 : i32
    %c0_i32_2 = arith.constant 0 : i32
    return %c0_i32, %c0_i32_0, %c0_i32_1 : i32, i32, i32
  }
  func.func @transform_6(%arg0: i32) -> (i32, i32, i32) {
    %c0_i32 = arith.constant 0 : i32
    %c0_i32_0 = arith.constant 0 : i32
    %c0_i32_1 = arith.constant 0 : i32
    %c0_i32_2 = arith.constant 0 : i32
    return %c0_i32, %c0_i32_0, %c0_i32_1 : i32, i32, i32
  }
}

module attributes {stable_mosaic.version = 11 : i64} {
  func.func @linear_kernel(%arg0: memref<16x64xf32, #tpu.memory_space<vmem>>, %arg1: memref<64x256xbf16, #tpu.memory_space<vmem>>, %arg2: memref<1x256xf32, #tpu.memory_space<vmem>>, %arg3: memref<16x256xf32, #tpu.memory_space<vmem>>) attributes {dimension_semantics = [], scalar_prefetch = 0 : i64, scratch_operands = 0 : i64, tpu.core_type = #tpu.core_type<tc>} {
    %c0 = arith.constant 0 : index
    %c0_0 = arith.constant 0 : index
    %0 = vector.load %arg0[%c0, %c0_0] : memref<16x64xf32, #tpu.memory_space<vmem>>, vector<16x64xf32>
    %1 = arith.truncf %0 : vector<16x64xf32> to vector<16x64xbf16>
    %c0_1 = arith.constant 0 : index
    %c0_2 = arith.constant 0 : index
    %2 = vector.load %arg1[%c0_1, %c0_2] : memref<64x256xbf16, #tpu.memory_space<vmem>>, vector<64x256xbf16>
    %cst = arith.constant dense<0.000000e+00> : vector<16x256xf32>
    %3 = tpu.matmul %1, %2, %cst {dimension_numbers = #tpu.dot_dimension_numbers<[1], [0], [0], [1], [0, 0, 1, 1], [], []>} : vector<16x64xbf16>, vector<64x256xbf16>, vector<16x256xf32> -> vector<16x256xf32>
    %c0_3 = arith.constant 0 : index
    %c0_4 = arith.constant 0 : index
    %4 = vector.load %arg2[%c0_3, %c0_4] : memref<1x256xf32, #tpu.memory_space<vmem>>, vector<1x256xf32>
    %5 = vector.broadcast %4 : vector<1x256xf32> to vector<16x256xf32>
    %6 = arith.addf %3, %5 : vector<16x256xf32>
    %c0_5 = arith.constant 0 : index
    %c0_6 = arith.constant 0 : index
    %7 = vector.load %arg3[%c0_5, %c0_6] : memref<16x256xf32, #tpu.memory_space<vmem>>, vector<16x256xf32>
    tpu.vector_store %arg3[%c0_5, %c0_6], %6 {strides = array<i32>} : memref<16x256xf32, #tpu.memory_space<vmem>>, vector<16x256xf32>,
    return
  }
}

module attributes {stable_mosaic.version = 11 : i64} {
  func.func @linear_kernel(%arg0: memref<8x64xf32, #tpu.memory_space<vmem>>, %arg1: memref<64x32xbf16, #tpu.memory_space<vmem>>, %arg2: memref<1x32xf32, #tpu.memory_space<vmem>>, %arg3: memref<8x32xf32, #tpu.memory_space<vmem>>) attributes {dimension_semantics = [], scalar_prefetch = 0 : i64, scratch_operands = 0 : i64, tpu.core_type = #tpu.core_type<tc>} {
    %c0 = arith.constant 0 : index
    %c0_0 = arith.constant 0 : index
    %0 = vector.load %arg0[%c0, %c0_0] : memref<8x64xf32, #tpu.memory_space<vmem>>, vector<8x64xf32>
    %1 = arith.truncf %0 : vector<8x64xf32> to vector<8x64xbf16>
    %c0_1 = arith.constant 0 : index
    %c0_2 = arith.constant 0 : index
    %2 = vector.load %arg1[%c0_1, %c0_2] : memref<64x32xbf16, #tpu.memory_space<vmem>>, vector<64x32xbf16>
    %cst = arith.constant dense<0.000000e+00> : vector<8x32xf32>
    %3 = tpu.matmul %1, %2, %cst {dimension_numbers = #tpu.dot_dimension_numbers<[1], [0], [0], [1], [0, 0, 1, 1], [], []>} : vector<8x64xbf16>, vector<64x32xbf16>, vector<8x32xf32> -> vector<8x32xf32>
    %c0_3 = arith.constant 0 : index
    %c0_4 = arith.constant 0 : index
    %4 = vector.load %arg2[%c0_3, %c0_4] : memref<1x32xf32, #tpu.memory_space<vmem>>, vector<1x32xf32>
    %5 = vector.broadcast %4 : vector<1x32xf32> to vector<8x32xf32>
    %6 = arith.addf %3, %5 : vector<8x32xf32>
    %c0_5 = arith.constant 0 : index
    %c0_6 = arith.constant 0 : index
    %7 = vector.load %arg3[%c0_5, %c0_6] : memref<8x32xf32, #tpu.memory_space<vmem>>, vector<8x32xf32>
    tpu.vector_store %arg3[%c0_5, %c0_6], %6 {strides = array<i32>} : memref<8x32xf32, #tpu.memory_space<vmem>>, vector<8x32xf32>,
    return
  }
}

</mosaic_0001>

<bundles_post_ra>
// kernel: encoder_forward.7
= control target key start
LH: loop header
LB: loop body
LE: loop exit
PB: predicated region body
PF: predicated region fallthrough
CT: control target
= control target key end

     0   :  { %v155_v1 = vmov 0   ;;  %vm78_vm0 = vcmask 523264   ;;  %v28_v12 = vlaneseq  ;;  %s221_s1 = inlined_call_operand.vmem [shape: bf16[64,256], index: 1, kind: input, shape index: {}]   ;;  %s222_s0 = inlined_call_operand.vmem [shape: f32[16,64], index: 0, kind: input, shape index: {}]   ;;  %s223_s2 = inlined_call_operand.vmem [shape: f32[1,256], index: 2, kind: input, shape index: {}]   ;;  %s224_s3 = inlined_call_operand.vmem [shape: f32[16,256], index: 3, kind: output, shape index: {}]  }
   0x1   :  { %v143_v0 = vld [vmem:[%s221_s1 + $0x4] ss:$8 sps:$4 sm:$0xff]   ;;  %114 = vmatprep.mubr.bf16.mxu0 %v155_v1  ;;  %v145_v2 = vld [vmem:[%s221_s1] ss:$8 sps:$4 sm:$0xff]   ;;  %v146_v3 = vld [vmem:[%s221_s1 + $0x14] ss:$8 sps:$4 sm:$0xff]  }
   0x2   :  { %82 = vmatprep.subr.bf16.mxu0 %v143_v0  ;;  %v148_v4 = vld [vmem:[%s221_s1 + $0x10] ss:$8 sps:$4 sm:$0xff]   ;;  %v149_v5 = vld [vmem:[%s221_s1 + $0x24] ss:$8 sps:$4 sm:$0xff]   ;;  %v151_v6 = vld [vmem:[%s221_s1 + $0x20] ss:$8 sps:$4 sm:$0xff]  }
   0x3   :  { %83 = vmatpush1.bf16.msra.mxu0 %v145_v2  ;;  %v152_v7 = vld [vmem:[%s221_s1 + $0x34] ss:$8 sps:$4 sm:$0xff]   ;;  %v154_v8 = vld [vmem:[%s221_s1 + $0x30] ss:$8 sps:$4 sm:$0xff]   ;;  %v15_v9 = vld [vmem:[%s222_s0] sm:$0xff]  ;;  %v29_v13 = vshrl.u32 %v28_v12, 7 }
   0x4   :  { %84 = vmatprep.subr.bf16.mxu0 %v146_v3  ;;  %v16_v10 = vld [vmem:[%s222_s0 + $0x8] sm:$0xff]  ;;  %v26_v15 = vld [vmem:[%s223_s2] sm:$0x3] }
   0x5   :  { %v17_v11 = vpack.c.bf16 %v16_v10, %v15_v9  ;;  %v30_v14 = vsub.s32 0, %v29_v13  ;;  %v34_v16 = vsub.s32 1, %v29_v13 }
   0x7   :  { %85 = vmatpush1.bf16.msra.mxu0 %v148_v4  ;;  %v31_v17 = vrot.slane %v26_v15, %v30_v14  ;;  %v35_v18 = vrot.slane %v26_v15, %v34_v16 }
   0x8   :  { %86 = vmatprep.subr.bf16.mxu0 %v149_v5 }
   0xb   :  { %87 = vmatpush1.bf16.msra.mxu0 %v151_v6 }
   0xc   :  { %88 = vmatprep.subr.bf16.mxu0 %v152_v7 }
   0xf   :  { %89 = vmatpush1.bf16.msra.mxu0 %v154_v8 }
  0x12   :  { %141 = vmatmul.mubr.msk.bf16.vlgmr.msra.gmra.mrb[0].mxu0 %vm78_vm0, %v17_v11 }
  0xe5   :  { %v116_v19 = vpop.f32.mrb[0].mxu0 }
  0xe6   :  { %v117_v20 = vadd.f32 %v116_v19, %v31_v17  ;;  %v118_v21 = vpop.f32.mrb[1].mxu0 }
  0xe7   :  { %v119_v22 = vadd.f32 %v118_v21, %v35_v18  ;;  %v120_v23 = vpop.f32.mrb[2].mxu0 }
  0xe8   :  { %125 = vst [vmem:[%s224_s3] sm:$0xff] %v117_v20  ;;  %v121_v24 = vadd.f32 %v120_v23, %v31_v17  ;;  %v122_v25 = vpop.f32.mrb[3].mxu0 }
  0xe9   :  { %126 = vst [vmem:[%s224_s3 + $0x8] sm:$0xff] %v119_v22  ;;  %v123_v26 = vadd.f32 %v122_v25, %v35_v18 }
  0xea   :  { %127 = vst [vmem:[%s224_s3 + $0x10] sm:$0xff] %v121_v24 }
  0xeb   :  { %128 = vst [vmem:[%s224_s3 + $0x18] sm:$0xff] %v123_v26 }

// kernel: encoder_forward.5
= control target key start
LH: loop header
LB: loop body
LE: loop exit
PB: predicated region body
PF: predicated region fallthrough
CT: control target
= control target key end

     0   :  { %v104_v1 = vmov 0   ;;  %vm42_vm0 = vcmask 130048   ;;  %v22_v6 = vlaneseq  ;;  %s152_s1 = inlined_call_operand.vmem [shape: bf16[16,256], index: 1, kind: input, shape index: {}]   ;;  %s153_s0 = inlined_call_operand.vmem [shape: f32[16,16], index: 0, kind: input, shape index: {}]   ;;  %s154_s2 = inlined_call_operand.vmem [shape: f32[1,256], index: 2, kind: input, shape index: {}]   ;;  %s155_s3 = inlined_call_operand.vmem [shape: f32[16,256], index: 3, kind: output, shape index: {}]  }
   0x1   :  { %v101_v0 = vld [vmem:[%s152_s1 + $0x4] ss:$8 sps:$4 sm:$0xff]   ;;  %78 = vmatprep.mubr.bf16.mxu0 %v104_v1  ;;  %v103_v2 = vld [vmem:[%s152_s1] ss:$8 sps:$4 sm:$0xff]  }
   0x2   :  { %v15_v3 = vld [vmem:[%s153_s0] sm:$0xff]  ;;  %v16_v4 = vld [vmem:[%s153_s0 + $0x8] sm:$0xff]  ;;  %46 = vmatprep.subr.bf16.mxu0 %v101_v0  ;;  %v23_v7 = vshrl.u32 %v22_v6, 7 }
   0x3   :  { %v17_v5 = vpack.c.bf16 %v16_v4, %v15_v3  ;;  %47 = vmatpush1.bf16.msra.mxu0 %v103_v2  ;;  %v20_v9 = vld [vmem:[%s154_s2] sm:$0x3] }
   0x4   :  { %v24_v8 = vsub.s32 0, %v23_v7  ;;  %v28_v10 = vsub.s32 1, %v23_v7 }
   0x6   :  { %99 = vmatmul.mubr.msk.bf16.vlgmr.msra.gmra.mrb[0].mxu0 %vm42_vm0, %v17_v5  ;;  %v25_v11 = vrot.slane %v20_v9, %v24_v8  ;;  %v29_v12 = vrot.slane %v20_v9, %v28_v10 }
  0xd9   :  { %v80_v13 = vpop.f32.mrb[0].mxu0 }
  0xda   :  { %v81_v14 = vadd.f32 %v80_v13, %v25_v11  ;;  %v82_v15 = vpop.f32.mrb[1].mxu0 }
  0xdb   :  { %v83_v16 = vadd.f32 %v82_v15, %v29_v12  ;;  %v84_v17 = vpop.f32.mrb[2].mxu0 }
  0xdc   :  { %89 = vst [vmem:[%s155_s3] sm:$0xff] %v81_v14  ;;  %v85_v18 = vadd.f32 %v84_v17, %v25_v11  ;;  %v86_v19 = vpop.f32.mrb[3].mxu0 }
  0xdd   :  { %90 = vst [vmem:[%s155_s3 + $0x8] sm:$0xff] %v83_v16  ;;  %v87_v20 = vadd.f32 %v86_v19, %v29_v12 }
  0xde   :  { %91 = vst [vmem:[%s155_s3 + $0x10] sm:$0xff] %v85_v18 }
  0xdf   :  { %92 = vst [vmem:[%s155_s3 + $0x18] sm:$0xff] %v87_v20 }

// kernel: encoder_forward.9
= control target key start
LH: loop header
LB: loop body
LE: loop exit
PB: predicated region body
PF: predicated region fallthrough
CT: control target
= control target key end

     0   :  { %v135_v0 = vmov 0.0   ;;  %vm136_vm0 = vmmov 0   ;;  %vm56_vm1 = vcmask 523264   ;;  %vm100_vm2 = vcmask 261120   ;;  %s178_s1 = inlined_call_operand.vmem [shape: bf16[64,32], index: 1, kind: input, shape index: {}]   ;;  %s179_s0 = inlined_call_operand.vmem [shape: f32[8,64], index: 0, kind: input, shape index: {}]   ;;  %s180_s2 = inlined_call_operand.vmem [shape: f32[1,32], index: 2, kind: input, shape index: {}]   ;;  %s181_s3 = inlined_call_operand.vmem [shape: f32[8,32], index: 3, kind: output, shape index: {}]  }
   0x1   :  { %117 = vmatprep.subr.bf16.mxu0 %v135_v0  ;;  %v131_v1 = vld [vmem:[%s178_s1] sm:$0xff]   ;;  %125 = vmatprep.mubr.msk.bf16.mxu0 %vm136_vm0, %v135_v0  ;;  %v132_v2 = vld [vmem:[%s178_s1 + $0x8] sm:$0xff]   ;;  %v133_v3 = vld [vmem:[%s178_s1 + $0x10] sm:$0xff]  }
   0x2   :  { %118 = vmatpush3.bf16.msra.mxu0 %v131_v1  ;;  %v134_v4 = vld [vmem:[%s178_s1 + $0x18] sm:$0xff]   ;;  %v15_v5 = vld [vmem:[%s179_s0] sm:$0xff] }
   0x3   :  { %119 = vmatprep.subr.bf16.mxu0 %v135_v0  ;;  %v16_v6 = vpack.c.bf16 %v15_v5, %v15_v5  ;;  %v106_v7 = vld [vmem:[%s180_s2] ss:$0 sm:$0xff] }
   0x6   :  { %120 = vmatpush3.bf16.msra.mxu0 %v132_v2 }
   0x7   :  { %121 = vmatprep.subr.bf16.mxu0 %v135_v0 }
   0xa   :  { %122 = vmatpush3.bf16.msra.mxu0 %v133_v3 }
   0xb   :  { %123 = vmatprep.subr.bf16.mxu0 %v135_v0 }
   0xe   :  { %124 = vmatpush3.bf16.msra.mxu0 %v134_v4 }
  0x11   :  { %126 = vmatmul.mubr.msk.bf16.vlgmr.msra.gmra.mrb[0].mxu0 %vm56_vm1, %v16_v6 }
  0xe4   :  { %v94_v8 = vpop.f32.mrb[0].mxu0 }
  0xe5   :  { %v95_v9 = vadd.f32 %v106_v7, %v94_v8  ;;  %v127_v10 = vpop.f32.mrb[1].mxu0 }
  0xe6   :  { %v97_v11 = vpop.f32.mrb[2].mxu0 }
  0xe7   :  { %101 = vst.msk [vmem:[%s181_s3] sm:$0xff] %vm100_vm2, %v95_v9  ;;  %v128_v12 = vpop.f32.mrb[3].mxu0 }

// kernel: encoder_forward.6
= control target key start
LH: loop header
LB: loop body
LE: loop exit
PB: predicated region body
PF: predicated region fallthrough
CT: control target
= control target key end

     0   :  { %s1382_s21 = smov 0   ;;  %s1629_s0 = inlined_call_operand.vmem [shape: f32[8,2,128], index: 0, kind: input, shape index: {}]   ;;  %s1630_s1 = inlined_call_operand.vmem [shape: f32[8,2,128], index: 1, kind: input, shape index: {}]   ;;  %s1631_s2 = inlined_call_operand.vmem [shape: bf16[2,32,128], index: 2, kind: input, shape index: {}]   ;;  %s1632_s3 = inlined_call_operand.vmem [shape: f32[8,2,32], index: 3, kind: output, shape index: {0}]   ;;  %s1633_s4 = inlined_call_operand.vmem [shape: f32[8,2,32], index: 4, kind: output, shape index: {1}]   ;;  %s1634_s5 = inlined_call_operand.vmem [shape: f32[2,2,32], index: 5, kind: output, shape index: {2}]   ;;  %s1635_s6 = inlined_call_operand.vmem [shape: f32[2,2,32], index: 6, kind: output, shape index: {3}]  }
   0x1 LB: > { %s1107_s22 = sadd.s32 4294967295, %s1339_s21   ;;  %p1111_p0 = scmp.ge.s32.totalorder %s1339_s21, 1  ;;  %s1339_s21 = sphi %s1382_s21, %s17_s21  }
   0x2   : > { %p227_p1 = scmp.lt.s32.totalorder %s1339_s21, 3 }
   0x4   : > { %p228_p2 = pnand %p1111_p0, %p227_p1 }
   0x5   : > { %s1112_s23 = sshll.u32 (!%p228_p2), %s1107_s22, 2  ;;  %s275_s24 = ssub.s32 (!%p228_p2), 1, %s1107_s22 }
   0x6   : > { %231 = sbr.rel (%p228_p2) target bundleno = 2856 (0xb28), region = 32  ;;  %p270_p3 = scmp.lt.s32.totalorder (!%p228_p2), %s1112_s23, 7 }
   0x7   : > { %s1114_s25 = sshll.u32 (!%p228_p2), %s275_s24, 2  ;;  %p1120_p5 = scmp.ne.s32.totalorder (!%p228_p2), %s1107_s22, 0 }
   0x8   : > { %p277_p4 = scmp.lt.s32.totalorder (!%p228_p2), %s1114_s25, 7 }
   0xd   : > { %s1637_s23 = smov (!%p270_p3, %s1112_s23), 7  ;;  %s1639_s25 = smov (!%p277_p4, %s1114_s25), 7 }
   0xe   : > { %s1113_s26 = sshll.u32 %s1637_s23, 1  ;;  %s1115_s30 = sshll.u32 %s1639_s25, 1  ;;  %vm302_vm0 = vcmask (!%p1120_p5), 254976   ;;  %v1341_v0 = vmov (!%p1120_p5), 0.0  }
   0xf   : > { %s1393_s29 = scalar_lea.vmem %s1629_s0, %s1113_s26  ;;  %s1398_s9 = scalar_lea.vmem %s1630_s1, %s1115_s30  ;;  %303 = vst.msk [vmem:[%s1634_s5] sm:$0x3] (!%p1120_p5), %vm302_vm0, %v1341_v0  ;;  %304 = vst.msk [vmem:[%s1634_s5 + $0x2] sm:$0x3] (!%p1120_p5), %vm302_vm0, %v1341_v0 }
  0x10   : > { %s1403_s12 = scalar_lea.vmem %s1632_s3, %s1113_s26  ;;  %s1408_s15 = scalar_lea.vmem %s1633_s4, %s1115_s30  ;;  %305 = vst.msk [vmem:[%s1635_s6] sm:$0x3] (!%p1120_p5), %vm302_vm0, %v1341_v0  ;;  %306 = vst.msk [vmem:[%s1635_s6 + $0x2] sm:$0x3] (!%p1120_p5), %vm302_vm0, %v1341_v0 }
  0x11   : > { %301 = sbr.rel (%p1120_p5) target bundleno = 24 (0x18), region = 36 }
  0x18 PF: > { %v1425_v1 = vld [vmem:[%s1631_s2] sm:$0xff]   ;;  %v1342_v2 = vmov 0.0   ;;  %v1432_v3 = vld [vmem:[%s1631_s2 + $0x10] sm:$0xff]   ;;  %v1438_v4 = vld [vmem:[%s1631_s2 + $0x8] sm:$0xff]   ;;  %vm1343_vm1 = vmmov 0   ;;  %s1344_s19 = smov 32  }
  0x19   : > { %1187 = vmatprep.subr.bf16.mxu0 %v1342_v2  ;;  %1195 = vmatprep.subr.bf16.mxu1 %v1342_v2  ;;  %v1447_v5 = vld [vmem:[%s1631_s2 + $0x18] sm:$0xff]   ;;  %v316_v6 = vld [vmem:[%s1634_s5] sm:$0x3]  ;;  %v1125_v7 = vld [vmem:[%s1634_s5 + $0x2] sm:$0x3]  ;;  %vm337_vm2 = vcmask 261120  }
  0x1a   : > { %1188 = vmatpush3.bf16.msra.mxu0 %v1425_v1  ;;  %1191 = vmatprep.mubr.msk.bf16.mxu0 %vm1343_vm1, %v1342_v2  ;;  %v317_v8 = vld [vmem:[%s1635_s6] sm:$0x3]  ;;  %v322_v9 = vpack.c.bf16 %v316_v6, %v316_v6  ;;  %v323_v10 = vpack.c.bf16 %v1125_v7, %v1125_v7  ;;  %v1126_v11 = vld [vmem:[%s1635_s6 + $0x2] sm:$0x3]  ;;  %v1131_v13 = vld [vmem:[%s1398_s9 + $0x6] sm:$0x3] }
  0x1b   : > { %1196 = vmatpush3.bf16.msra.mxu1 %v1432_v3  ;;  %1189 = vmatprep.subr.bf16.mxu0 %v1342_v2  ;;  %v324_v12 = vld [vmem:[%s1393_s29] sm:$0x3]  ;;  %s1345_s24 = smov 64   ;;  %v1137_v56 = vld [vmem:[%s1393_s29 + $0x2] sm:$0x3]  ;;  %vm498_vm3 = vcmask 254976  }
  0x1c   : > { %1197 = vmatprep.subr.bf16.mxu1 %v1342_v2  ;;  %1199 = vmatprep.mubr.msk.bf16.mxu1 %vm1343_vm1, %v1342_v2  ;;  %v1140_v61 = vld [vmem:[%s1398_s9 + $0x4] sm:$0x3] }
  0x1d   : > { %389 = vrot.lane.b32.xlu1 %v317_v8, %s1344_s19 }
  0x1e   : > { %1190 = vmatpush3.bf16.msra.mxu0 %v1438_v4 }
  0x1f   : > { %1198 = vmatpush3.bf16.msra.mxu1 %v1447_v5  ;;  %1203 = vmatprep.subr.bf16.mxu0 %v1342_v2 }
  0x20   : > { %1211 = vmatprep.subr.bf16.mxu1 %v1342_v2 }
  0x21   : > { %1192 = vmatmul.mubr.msk.bf16.vlgmr.msra.gmra.mrb[0].mxu0 %vm337_vm2, %v322_v9  ;;  %474 = vrot.lane.b32.xlu1 %v1126_v11, %s1344_s19 }
  0x22   : > { %1200 = vmatmul.mubr.msk.bf16.vlgmr.msra.gmra.mrb[0].mxu1 %vm337_vm2, %v323_v10  ;;  %1204 = vmatpush3.bf16.msra.mxu0 %v1425_v1 }
  0x23   : > { %1205 = vmatprep.subr.bf16.mxu0 %v1342_v2  ;;  %1212 = vmatpush3.bf16.msra.mxu1 %v1432_v3 }
  0x24   : > { %1207 = vmatprep.mubr.msk.bf16.mxu0 %vm1343_vm1, %v1342_v2  ;;  %1213 = vmatprep.subr.bf16.mxu1 %v1342_v2 }
  0x25   : > { %1215 = vmatprep.mubr.msk.bf16.mxu1 %vm1343_vm1, %v1342_v2 }
  0x26   : > { %1206 = vmatpush3.bf16.msra.mxu0 %v1438_v4 }
  0x27   : > { %1214 = vmatpush3.bf16.msra.mxu1 %v1447_v5  ;;  %1219 = vmatprep.subr.bf16.mxu0 %v1342_v2 }
  0x28   : > { %1227 = vmatprep.subr.bf16.mxu1 %v1342_v2 }
  0x8f   : > { %v390_v38 = vpop.permute.xlu1 %389 }
  0x93   : > { %v475_v40 = vpop.permute.xlu1 %474 }
  0xf4   : > { %v375_v14 = vpop.f32.mrb[0].mxu0 }
  0xf5   : > { %v376_v15 = vadd.f32 %v375_v14, %v324_v12  ;;  %v1193_v16 = vpop.f32.mrb[1].mxu0  ;;  %v460_v17 = vpop.f32.mrb[0].mxu1 }
  0xf6   : > { %v461_v18 = vadd.f32 %v1131_v13, %v460_v17  ;;  %v378_v19 = vpop.f32.mrb[2].mxu0  ;;  %v1201_v20 = vpop.f32.mrb[1].mxu1 }
  0xf7   : > { %1269 = vtanh.f32 %v376_v15  ;;  %v1194_v21 = vpop.f32.mrb[3].mxu0  ;;  %v463_v22 = vpop.f32.mrb[2].mxu1  ;;  %v1130_v26 = vmul.f32 -1.442695, %v376_v15 }
  0xf8   : > { %v1202_v23 = vpop.f32.mrb[3].mxu1  ;;  %1271 = vtanh.f32 %v461_v18  ;;  %v1135_v27 = vmul.f32 -1.442695, %v461_v18 }
  0xf9   : > { %1273 = vpow2.f32 %v1130_v26 }
  0xfa   : > { %1275 = vpow2.f32 %v1135_v27 }
 0x101   : > { %v1270_v24 = vpop.eup %1269 }
 0x102   : > { %394 = vrot.lane.b32.xlu0 %v1270_v24, %s1345_s24  ;;  %v1272_v25 = vpop.eup %1271 }
 0x103   : > { %v1274_v28 = vpop.eup %1273 }
 0x104   : > { %v384_v29 = vadd.f32 1.0, %v1274_v28  ;;  %v1276_v30 = vpop.eup %1275 }
 0x105   : > { %v469_v31 = vadd.f32 1.0, %v1276_v30 }
 0x106   : > { %479 = vrot.lane.b32.xlu0 %v1272_v25, %s1345_s24  ;;  %1277 = vrcp.f32 %v384_v29 }
 0x107   : > { %1279 = vrcp.f32 %v469_v31 }
 0x110   : > { %v1278_v32 = vpop.eup %1277 }
 0x111   : > { %v1280_v35 = vpop.eup %1279  ;;  %v392_v39 = vmul.f32 %v1278_v32, %v390_v38 }
 0x112   : > { %v477_v43 = vmul.f32 %v1280_v35, %v475_v40 }
 0x174   : > { %v395_v33 = vpop.permute.xlu0 %394 }
 0x175   : > { %v397_v34 = vmul.f32 %v1278_v32, %v395_v33 }
 0x177   : > { %399 = vrot.lane.b32.xlu0 %v397_v34, %s1344_s19 }
 0x178   : > { %v480_v36 = vpop.permute.xlu0 %479 }
 0x179   : > { %v482_v37 = vmul.f32 %v1280_v35, %v480_v36 }
 0x17b   : > { %484 = vrot.lane.b32.xlu1 %v482_v37, %s1344_s19 }
 0x1e9   : > { %v400_v41 = vpop.permute.xlu0 %399 }
 0x1ea   : > { %v1490_v42 = vadd.f32 %v400_v41, %v392_v39 }
 0x1ec   : > { %1281 = vtanh.f32 %v1490_v42 }
 0x1ed   : > { %v485_v44 = vpop.permute.xlu1 %484 }
 0x1ee   : > { %v1493_v45 = vadd.f32 %v485_v44, %v477_v43  ;;  %v1148_v43 = vld [vmem:[%s1398_s9 + $0x2] sm:$0x3] }
 0x1f0   : > { %1283 = vtanh.f32 %v1493_v45 }
 0x1f6   : > { %v1282_v46 = vpop.eup %1281 }
 0x1f7   : > { %405 = vrot.lane.b32.xlu0 %v1282_v46, %s1345_s24 }
 0x1fa   : > { %v1284_v47 = vpop.eup %1283 }
 0x1fb   : > { %490 = vrot.lane.b32.xlu1 %v1284_v47, %s1345_s24 }
 0x269   : > { %v406_v48 = vpop.permute.xlu0 %405 }
 0x26a   : > { %v1498_v49 = vmul.f32 %v1278_v32, %v406_v48 }
 0x26c   : > { %v506_v50 = vpack.c.bf16 %v1498_v49, %v1498_v49 }
 0x26d   : > { %v491_v51 = vpop.permute.xlu1 %490 }
 0x26e   : > { %v1502_v52 = vmul.f32 %v1280_v35, %v491_v51  ;;  %511 = vrot.lane.b32.xlu0 %v506_v50, %s1344_s19 }
 0x270   : > { %v507_v53 = vpack.c.bf16 %v1502_v52, %v1502_v52 }
 0x272   : > { %583 = vrot.lane.b32.xlu1 %v507_v53, %s1344_s19 }
 0x2e0   : > { %v512_v54 = vpop.permute.xlu0 %511 }
 0x2e1   : > { %1208 = vmatmul.mubr.msk.bf16.vlgmr.msra.gmra.mrb[4].mxu0 %vm337_vm2, %v512_v54 }
 0x2e2   : > { %1220 = vmatpush3.bf16.msra.mxu0 %v1425_v1  ;;  %1223 = vmatprep.mubr.msk.bf16.mxu0 %vm1343_vm1, %v1342_v2 }
 0x2e3   : > { %1221 = vmatprep.subr.bf16.mxu0 %v1342_v2 }
 0x2e4   : > { %v584_v55 = vpop.permute.xlu1 %583 }
 0x2e5   : > { %1216 = vmatmul.mubr.msk.bf16.vlgmr.msra.gmra.mrb[4].mxu1 %vm337_vm2, %v584_v55 }
 0x2e6   : > { %1228 = vmatpush3.bf16.msra.mxu1 %v1432_v3  ;;  %1222 = vmatpush3.bf16.msra.mxu0 %v1438_v4 }
 0x2e7   : > { %1229 = vmatprep.subr.bf16.mxu1 %v1342_v2  ;;  %1231 = vmatprep.mubr.msk.bf16.mxu1 %vm1343_vm1, %v1342_v2 }
 0x2e8   : > { %1235 = vmatprep.subr.bf16.mxu0 %v1342_v2 }
 0x2ea   : > { %1230 = vmatpush3.bf16.msra.mxu1 %v1447_v5 }
 0x2eb   : > { %1243 = vmatprep.subr.bf16.mxu1 %v1342_v2 }
 0x3b4   : > { %v550_v57 = vpop.f32.mrb[4].mxu0 }
 0x3b5   : > { %v551_v58 = vadd.f32 %v1137_v56, %v550_v57  ;;  %v1209_v59 = vpop.f32.mrb[5].mxu0 }
 0x3b6   : > { %v553_v60 = vpop.f32.mrb[6].mxu0 }
 0x3b7   : > { %1285 = vtanh.f32 %v551_v58  ;;  %v1210_v62 = vpop.f32.mrb[7].mxu0  ;;  %v1139_v11 = vmul.f32 -1.442695, %v551_v58 }
 0x3b8   : > { %v622_v63 = vpop.f32.mrb[4].mxu1 }
 0x3b9   : > { %v623_v0 = vadd.f32 %v1140_v61, %v622_v63  ;;  %v1217_v6 = vpop.f32.mrb[5].mxu1 }
 0x3ba   : > { %v625_v7 = vpop.f32.mrb[6].mxu1 }
 0x3bb   : > { %1287 = vtanh.f32 %v623_v0  ;;  %v1218_v8 = vpop.f32.mrb[7].mxu1  ;;  %v1142_v12 = vmul.f32 -1.442695, %v623_v0 }
 0x3bc   : > { %1289 = vpow2.f32 %v1139_v11 }
 0x3bd   : > { %1291 = vpow2.f32 %v1142_v12 }
 0x3c1   : > { %v1286_v9 = vpop.eup %1285 }
 0x3c2   : > { %565 = vrot.lane.b32.xlu0 %v1286_v9, %s1345_s24 }
 0x3c5   : > { %v1288_v10 = vpop.eup %1287 }
 0x3c6   : > { %637 = vrot.lane.b32.xlu1 %v1288_v10, %s1345_s24  ;;  %v1290_v13 = vpop.eup %1289 }
 0x3c7   : > { %v559_v14 = vadd.f32 1.0, %v1290_v13  ;;  %v1292_v15 = vpop.eup %1291 }
 0x3c8   : > { %v631_v16 = vadd.f32 1.0, %v1292_v15 }
 0x3c9   : > { %1293 = vrcp.f32 %v559_v14 }
 0x3ca   : > { %1295 = vrcp.f32 %v631_v16 }
 0x3d3   : > { %v1294_v17 = vpop.eup %1293 }
 0x3d4   : > { %v1296_v20 = vpop.eup %1295  ;;  %v563_v23 = vmul.f32 %v1294_v17, %v1490_v42 }
 0x3d5   : > { %v635_v26 = vmul.f32 %v1296_v20, %v1493_v45 }
 0x434   : > { %v566_v18 = vpop.permute.xlu0 %565 }
 0x435   : > { %v568_v19 = vmul.f32 %v1294_v17, %v566_v18 }
 0x437   : > { %570 = vrot.lane.b32.xlu0 %v568_v19, %s1344_s19  ;;  %v1153_v19 = vld [vmem:[%s1393_s29 + $0x6] sm:$0x3] }
 0x438   : > { %v638_v21 = vpop.permute.xlu1 %637 }
 0x439   : > { %v640_v22 = vmul.f32 %v1296_v20, %v638_v21 }
 0x43b   : > { %642 = vrot.lane.b32.xlu1 %v640_v22, %s1344_s19 }
 0x4a9   : > { %v571_v24 = vpop.permute.xlu0 %570 }
 0x4aa   : > { %v1529_v25 = vadd.f32 %v571_v24, %v563_v23  ;;  %v896_v24 = vld [vmem:[%s1398_s9] sm:$0x3] }
 0x4ac   : > { %1297 = vtanh.f32 %v1529_v25 }
 0x4ad   : > { %v643_v27 = vpop.permute.xlu1 %642 }
 0x4ae   : > { %v1533_v28 = vadd.f32 %v643_v27, %v635_v26 }
 0x4b0   : > { %1299 = vtanh.f32 %v1533_v28 }
 0x4b6   : > { %v1298_v29 = vpop.eup %1297 }
 0x4b7   : > { %576 = vrot.lane.b32.xlu0 %v1298_v29, %s1345_s24 }
 0x4ba   : > { %v1300_v30 = vpop.eup %1299 }
 0x4bb   : > { %648 = vrot.lane.b32.xlu1 %v1300_v30, %s1345_s24 }
 0x529   : > { %v577_v31 = vpop.permute.xlu0 %576 }
 0x52a   : > { %v1538_v32 = vmul.f32 %v1294_v17, %v577_v31 }
 0x52c   : > { %v664_v33 = vpack.c.bf16 %v1538_v32, %v1538_v32 }
 0x52d   : > { %v649_v34 = vpop.permute.xlu1 %648 }
 0x52e   : > { %v1542_v35 = vmul.f32 %v1296_v20, %v649_v34  ;;  %669 = vrot.lane.b32.xlu0 %v664_v33, %s1344_s19 }
 0x530   : > { %v665_v36 = vpack.c.bf16 %v1542_v35, %v1542_v35 }
 0x532   : > { %741 = vrot.lane.b32.xlu1 %v665_v36, %s1344_s19 }
 0x5a0   : > { %v670_v37 = vpop.permute.xlu0 %669 }
 0x5a1   : > { %1224 = vmatmul.mubr.msk.bf16.vlgmr.msra.gmra.mrb[8].mxu0 %vm337_vm2, %v670_v37 }
 0x5a2   : > { %1236 = vmatpush3.bf16.msra.mxu0 %v1425_v1  ;;  %1239 = vmatprep.mubr.msk.bf16.mxu0 %vm1343_vm1, %v1342_v2  ;;  %v1145_v1 = vld [vmem:[%s1393_s29 + $0x4] sm:$0x3]  ;;  %s1346_s29 = smov 96  }
 0x5a3   : > { %1237 = vmatprep.subr.bf16.mxu0 %v1342_v2 }
 0x5a4   : > { %v742_v38 = vpop.permute.xlu1 %741 }
 0x5a5   : > { %1232 = vmatmul.mubr.msk.bf16.vlgmr.msra.gmra.mrb[8].mxu1 %vm337_vm2, %v742_v38 }
 0x5a6   : > { %1244 = vmatpush3.bf16.msra.mxu1 %v1432_v3  ;;  %1238 = vmatpush3.bf16.msra.mxu0 %v1438_v4 }
 0x5a7   : > { %1245 = vmatprep.subr.bf16.mxu1 %v1342_v2  ;;  %1247 = vmatprep.mubr.msk.bf16.mxu1 %vm1343_vm1, %v1342_v2 }
 0x5aa   : > { %1246 = vmatpush3.bf16.msra.mxu1 %v1447_v5 }
 0x674   : > { %v708_v39 = vpop.f32.mrb[8].mxu0 }
 0x675   : > { %v709_v40 = vadd.f32 %v1145_v1, %v708_v39  ;;  %v1225_v41 = vpop.f32.mrb[9].mxu0 }
 0x676   : > { %v711_v42 = vpop.f32.mrb[10].mxu0 }
 0x677   : > { %1301 = vtanh.f32 %v709_v40  ;;  %v1226_v44 = vpop.f32.mrb[11].mxu0  ;;  %v1147_v5 = vmul.f32 -1.442695, %v709_v40 }
 0x678   : > { %v780_v45 = vpop.f32.mrb[8].mxu1 }
 0x679   : > { %v781_v46 = vadd.f32 %v1148_v43, %v780_v45  ;;  %v1233_v3 = vpop.f32.mrb[9].mxu1 }
 0x67a   : > { %v783_v47 = vpop.f32.mrb[10].mxu1 }
 0x67b   : > { %1303 = vtanh.f32 %v781_v46  ;;  %v1234_v4 = vpop.f32.mrb[11].mxu1  ;;  %v1150_v50 = vmul.f32 -1.442695, %v781_v46 }
 0x67c   : > { %1305 = vpow2.f32 %v1147_v5 }
 0x67d   : > { %1307 = vpow2.f32 %v1150_v50 }
 0x681   : > { %v1302_v48 = vpop.eup %1301 }
 0x682   : > { %723 = vrot.lane.b32.xlu0 %v1302_v48, %s1345_s24 }
 0x685   : > { %v1304_v2 = vpop.eup %1303 }
 0x686   : > { %795 = vrot.lane.b32.xlu1 %v1304_v2, %s1345_s24  ;;  %v1306_v51 = vpop.eup %1305 }
 0x687   : > { %v717_v53 = vadd.f32 1.0, %v1306_v51  ;;  %v1308_v54 = vpop.eup %1307 }
 0x688   : > { %v789_v55 = vadd.f32 1.0, %v1308_v54 }
 0x689   : > { %1309 = vrcp.f32 %v717_v53 }
 0x68a   : > { %1311 = vrcp.f32 %v789_v55 }
 0x693   : > { %v1310_v56 = vpop.eup %1309 }
 0x694   : > { %v1312_v59 = vpop.eup %1311  ;;  %v721_v62 = vmul.f32 %v1310_v56, %v1529_v25 }
 0x695   : > { %v793_v6 = vmul.f32 %v1312_v59, %v1533_v28 }
 0x6f4   : > { %v724_v57 = vpop.permute.xlu0 %723 }
 0x6f5   : > { %v726_v58 = vmul.f32 %v1310_v56, %v724_v57 }
 0x6f7   : > { %728 = vrot.lane.b32.xlu0 %v726_v58, %s1344_s19 }
 0x6f8   : > { %v796_v60 = vpop.permute.xlu1 %795 }
 0x6f9   : > { %v798_v61 = vmul.f32 %v1312_v59, %v796_v60 }
 0x6fb   : > { %800 = vrot.lane.b32.xlu1 %v798_v61, %s1344_s19 }
 0x769   : > { %v729_v63 = vpop.permute.xlu0 %728 }
 0x76a   : > { %v731_v0 = vadd.f32 %v729_v63, %v721_v62 }
 0x76c   : > { %1313 = vtanh.f32 %v731_v0 }
 0x76d   : > { %v801_v7 = vpop.permute.xlu1 %800 }
 0x76e   : > { %v803_v8 = vadd.f32 %v801_v7, %v793_v6 }
 0x770   : > { %1315 = vtanh.f32 %v803_v8 }
 0x776   : > { %v1314_v9 = vpop.eup %1313 }
 0x777   : > { %734 = vrot.lane.b32.xlu0 %v1314_v9, %s1345_s24 }
 0x77a   : > { %v1316_v10 = vpop.eup %1315 }
 0x77b   : > { %806 = vrot.lane.b32.xlu1 %v1316_v10, %s1345_s24 }
 0x7e9   : > { %v735_v11 = vpop.permute.xlu0 %734 }
 0x7ea   : > { %v737_v12 = vmul.f32 %v1310_v56, %v735_v11 }
 0x7ec   : > { %v822_v13 = vpack.c.bf16 %v737_v12, %v737_v12 }
 0x7ed   : > { %v807_v14 = vpop.permute.xlu1 %806 }
 0x7ee   : > { %v809_v15 = vmul.f32 %v1312_v59, %v807_v14  ;;  %827 = vrot.lane.b32.xlu0 %v822_v13, %s1344_s19 }
 0x7f0   : > { %v823_v16 = vpack.c.bf16 %v809_v15, %v809_v15 }
 0x7f2   : > { %898 = vrot.lane.b32.xlu1 %v823_v16, %s1344_s19 }
 0x860   : > { %v828_v17 = vpop.permute.xlu0 %827 }
 0x861   : > { %1240 = vmatmul.mubr.msk.bf16.vlgmr.msra.gmra.mrb[12].mxu0 %vm337_vm2, %v828_v17 }
 0x864   : > { %v899_v18 = vpop.permute.xlu1 %898 }
 0x865   : > { %1248 = vmatmul.mubr.msk.bf16.vlgmr.msra.gmra.mrb[12].mxu1 %vm337_vm2, %v899_v18 }
 0x934   : > { %v866_v20 = vpop.f32.mrb[12].mxu0 }
 0x935   : > { %v867_v21 = vadd.f32 %v1153_v19, %v866_v20  ;;  %v1241_v22 = vpop.f32.mrb[13].mxu0 }
 0x936   : > { %v869_v23 = vpop.f32.mrb[14].mxu0 }
 0x937   : > { %1317 = vtanh.f32 %v867_v21  ;;  %v1242_v25 = vpop.f32.mrb[15].mxu0  ;;  %v1155_v34 = vmul.f32 -1.442695, %v867_v21 }
 0x938   : > { %v937_v26 = vpop.f32.mrb[12].mxu1 }
 0x939   : > { %v938_v27 = vadd.f32 %v937_v26, %v896_v24  ;;  %v1249_v28 = vpop.f32.mrb[13].mxu1 }
 0x93a   : > { %v940_v29 = vpop.f32.mrb[14].mxu1 }
 0x93b   : > { %1319 = vtanh.f32 %v938_v27  ;;  %v1250_v30 = vpop.f32.mrb[15].mxu1  ;;  %v1157_v36 = vmul.f32 -1.442695, %v938_v27 }
 0x93c   : > { %1321 = vpow2.f32 %v1155_v34 }
 0x93d   : > { %1323 = vpow2.f32 %v1157_v36 }
 0x941   : > { %v1318_v31 = vpop.eup %1317 }
 0x942   : > { %881 = vrot.lane.b32.xlu0 %v1318_v31, %s1345_s24 }
 0x945   : > { %v1320_v33 = vpop.eup %1319 }
 0x946   : > { %952 = vrot.lane.b32.xlu1 %v1320_v33, %s1345_s24  ;;  %v1322_v37 = vpop.eup %1321 }
 0x947   : > { %v875_v38 = vadd.f32 1.0, %v1322_v37  ;;  %v1324_v1 = vpop.eup %1323 }
 0x948   : > { %v946_v39 = vadd.f32 1.0, %v1324_v1 }
 0x949   : > { %1325 = vrcp.f32 %v875_v38 }
 0x94a   : > { %1327 = vrcp.f32 %v946_v39 }
 0x953   : > { %v1326_v40 = vpop.eup %1325 }
 0x954   : > { %v1328_v43 = vpop.eup %1327  ;;  %v879_v46 = vmul.f32 %v1326_v40, %v731_v0 }
 0x955   : > { %v950_v4 = vmul.f32 %v1328_v43, %v803_v8 }
 0x9b4   : > { %v882_v41 = vpop.permute.xlu0 %881 }
 0x9b5   : > { %v884_v42 = vmul.f32 %v1326_v40, %v882_v41 }
 0x9b7   : > { %886 = vrot.lane.b32.xlu0 %v884_v42, %s1344_s19 }
 0x9b8   : > { %v953_v44 = vpop.permute.xlu1 %952 }
 0x9b9   : > { %v955_v45 = vmul.f32 %v1328_v43, %v953_v44 }
 0x9bb   : > { %957 = vrot.lane.b32.xlu1 %v955_v45, %s1344_s19 }
 0xa29   : > { %v887_v3 = vpop.permute.xlu0 %886 }
 0xa2a   : > { %v889_v47 = vadd.f32 %v887_v3, %v879_v46 }
 0xa2c   : > { %1329 = vtanh.f32 %v889_v47 }
 0xa2d   : > { %v958_v48 = vpop.permute.xlu1 %957 }
 0xa2e   : > { %v960_v2 = vadd.f32 %v958_v48, %v950_v4 }
 0xa30   : > { %1331 = vtanh.f32 %v960_v2 }
 0xa36   : > { %v1330_v5 = vpop.eup %1329 }
 0xa37   : > { %892 = vrot.lane.b32.xlu0 %v1330_v5, %s1345_s24 }
 0xa3a   : > { %v1332_v50 = vpop.eup %1331 }
 0xa3b   : > { %963 = vrot.lane.b32.xlu1 %v1332_v50, %s1345_s24  ;;  %495 = vrot.lane.b32.xlu0 %v1498_v49, %s1344_s19 }
 0xa3f   : > { %501 = vrot.lane.b32.xlu1 %v1502_v52, %s1344_s19  ;;  %653 = vrot.lane.b32.xlu0 %v1538_v32, %s1344_s19 }
 0xa43   : > { %659 = vrot.lane.b32.xlu1 %v1542_v35, %s1344_s19  ;;  %811 = vrot.lane.b32.xlu0 %v737_v12, %s1344_s19 }
 0xa47   : > { %817 = vrot.lane.b32.xlu1 %v809_v15, %s1344_s19 }
 0xaa9   : > { %v893_v51 = vpop.permute.xlu0 %892 }
 0xaaa   : > { %v895_v53 = vmul.f32 %v1326_v40, %v893_v51 }
 0xaac   : > { %968 = vrot.lane.b32.xlu0 %v895_v53, %s1344_s19 }
 0xaad   : > { %v964_v49 = vpop.permute.xlu1 %963  ;;  %v496_v52 = vpop.permute.xlu0 %495 }
 0xaae   : > { %v966_v32 = vmul.f32 %v1328_v43, %v964_v49  ;;  %499 = vst.msk [vmem:[%s1403_s12] sm:$0x3] %vm498_vm3, %v496_v52 }
 0xab0   : > { %974 = vrot.lane.b32.xlu1 %v966_v32, %s1344_s19  ;;  %981 = vrot.lane.b32.xlu0 %v889_v47, %s1346_s29 }
 0xab1   : > { %v502_v35 = vpop.permute.xlu1 %501  ;;  %v654_v54 = vpop.permute.xlu0 %653 }
 0xab2   : > { %1136 = vst.msk [vmem:[%s1408_s15 + $0x6] sm:$0x3] %vm498_vm3, %v502_v35  ;;  %1143 = vst.msk [vmem:[%s1403_s12 + $0x2] sm:$0x3] %vm498_vm3, %v654_v54 }
 0xab4   : > { %986 = vrot.lane.b32.xlu1 %v960_v2, %s1346_s29 }
 0xab5   : > { %v660_v55 = vpop.permute.xlu1 %659  ;;  %v812_v56 = vpop.permute.xlu0 %811 }
 0xab6   : > { %1144 = vst.msk [vmem:[%s1408_s15 + $0x4] sm:$0x3] %vm498_vm3, %v660_v55  ;;  %1151 = vst.msk [vmem:[%s1403_s12 + $0x4] sm:$0x3] %vm498_vm3, %v812_v56 }
 0xab9   : > { %v818_v57 = vpop.permute.xlu1 %817 }
 0xaba   : > { %1152 = vst.msk [vmem:[%s1408_s15 + $0x2] sm:$0x3] %vm498_vm3, %v818_v57 }
 0xb1e   : > { %v969_v58 = vpop.permute.xlu0 %968 }
 0xb1f   : > { %1158 = vst.msk [vmem:[%s1403_s12 + $0x6] sm:$0x3] %vm498_vm3, %v969_v58  ;;  %978 = vst.msk [vmem:[%s1634_s5] sm:$0x3] %vm498_vm3, %v969_v58 }
 0xb22   : > { %v975_v59 = vpop.permute.xlu1 %974  ;;  %v982_v60 = vpop.permute.xlu0 %981 }
 0xb23   : > { %977 = vst.msk [vmem:[%s1408_s15] sm:$0x3] %vm498_vm3, %v975_v59  ;;  %1159 = vst.msk [vmem:[%s1634_s5 + $0x2] sm:$0x3] %vm498_vm3, %v975_v59 }
 0xb24   : > { %984 = vst.msk [vmem:[%s1635_s6] sm:$0x3] %vm498_vm3, %v982_v60 }
 0xb26   : > { %v987_v61 = vpop.permute.xlu1 %986 }
 0xb27   : > { %1160 = vst.msk [vmem:[%s1635_s6 + $0x2] sm:$0x3] %vm498_vm3, %v987_v61 }
 0xb28 PF: > { %s17_s21 = sadd.s32 1, %s1339_s21  }
 0xb29   : > { %p14_p6 = scmp.ge.s32.totalorder %s17_s21, 4  }
 0xb2b   :  { %16 = sbr.rel (!%p14_p6) target bundleno = 1 (0x1), region = 112 }

</bundles_post_ra>
